<compile_context>
chip_gen: v6e
topology: v6e:2x2x1
jax: 0.10.0
libtpu: 0.0.40
codegen_flags: <defaults>
</compile_context>

<pallas_src>
import functools
import numpy as np
import jax
import jax.numpy as jnp
from jax.experimental import pallas as pl
from jax.experimental.pallas import tpu as pltpu


# ----------------------------- in-kernel helpers -----------------------------

def _layernorm(x, gamma, beta, eps=1e-6):
    mu = jnp.mean(x, axis=-1, keepdims=True)
    var = jnp.mean(jnp.square(x - mu), axis=-1, keepdims=True)
    return (x - mu) * jax.lax.rsqrt(var + eps) * gamma + beta


def _softmax(s):
    m = jnp.max(s, axis=-1, keepdims=True)
    e = jnp.exp(s - m)
    return e * pl.reciprocal(jnp.sum(e, axis=-1, keepdims=True), approx=True)


def _bmm(a, b, contract):
    # 3-D dot_general with a single leading batch dim (heads), f32 accumulation.
    return jax.lax.dot_general(a, b, dimension_numbers=(contract, ((0,), (0,))),
                               preferred_element_type=jnp.float32)


# ----------------------------- fused decoder kernel --------------------------

def fused_decoder_kernel(n_head, d_k, d_v, dff_tile, *refs):
    (x0_ref, enc_ref, tbias_ref, sbias_ref, g0_ref, b0_ref,
     wq1_ref, wk1_ref, wv1_ref, wo1_ref, g1_ref, b1_ref,
     wq2_ref, wk2_ref, wv2_ref, wo2_ref, g2_ref, b2_ref,
     w1_ref, bb1_ref, w2_ref, bb2_ref, g3_ref, b3_ref,
     out_ref) = refs

    layer = pl.program_id(1)

    # First layer step for this batch tile: resident activation = LN(embed + pos).
    # (Output blocks are not preloaded from HBM; this write must precede the read.)
    @pl.when(layer == 0)
    def _():
        out_ref[...] = _layernorm(x0_ref[...], g0_ref[...], b0_ref[...])

    _, L, D = out_ref.shape
    H = n_head
    bf16 = jnp.bfloat16

    x = out_ref[0]                       # (L, D) f32, carried across layers in VMEM
    tbias = tbias_ref[0]                 # (L, L) additive mask, f32
    sbias = sbias_ref[0]                 # (1, S) additive mask, f32

    def attend(xq_bf, kv_bf, bias, wq_r, wk_r, wv_r, wo_r):
        # xq_bf: (L, D) bf16 queries; kv_bf: (Lk, D) bf16 keys/values.
        Lk = kv_bf.shape[0]
        qb = jnp.broadcast_to(xq_bf[None], (H, L, D))           # head-batched views
        kb = qb if kv_bf is xq_bf else jnp.broadcast_to(kv_bf[None], (H, Lk, D))
        q = _bmm(qb, wq_r, ((2,), (1,)))                        # (H, L,  d_k) f32
        k = _bmm(kb, wk_r, ((2,), (1,)))                        # (H, Lk, d_k) f32
        v = _bmm(kb, wv_r, ((2,), (1,)))                        # (H, Lk, d_v) f32
        s = _bmm(q.astype(bf16), k.astype(bf16), ((2,), (2,)))  # (H, L, Lk) f32
        p = _softmax(s + bias)                                  # mask + softmax in f32
        o = _bmm(p.astype(bf16), v.astype(bf16), ((2,), (1,)))  # (H, L, d_v) f32
        # output projection: one head-batched matmul, then reduce over heads
        ob = _bmm(o.astype(bf16), wo_r, ((2,), (1,)))           # (H, L, D) f32
        return jnp.sum(ob, axis=0)                              # (L, D) f32

    # ---- masked self attention (post-LN residual); 1/sqrt(d_k) folded into Wq ----
    x_bf = x.astype(bf16)
    attn = attend(x_bf, x_bf, tbias[None],
                  wq1_ref[0], wk1_ref[0], wv1_ref[0], wo1_ref[0])
    x = _layernorm(attn + x, g1_ref[0], b1_ref[0])

    # ---- cross attention against the encoder output ----
    enc_bf = enc_ref[0].astype(bf16)
    attn = attend(x.astype(bf16), enc_bf, sbias[None],
                  wq2_ref[0], wk2_ref[0], wv2_ref[0], wo2_ref[0])
    x = _layernorm(attn + x, g2_ref[0], b2_ref[0])

    # ---- position-wise FFN (ReLU), tiled over d_inner to bound the intermediate ----
    x_bf = x.astype(bf16)
    d_inner = w1_ref.shape[-1]
    y = jnp.zeros((L, D), jnp.float32)
    for t in range(d_inner // dff_tile):          # static unroll; 1 tile at toy sizes
        sl = pl.ds(t * dff_tile, dff_tile)
        h = jnp.dot(x_bf, w1_ref[0, :, sl], preferred_element_type=jnp.float32)
        h = jnp.maximum(h + bb1_ref[0, :, sl], 0.0)
        y = y + jnp.dot(h.astype(bf16), w2_ref[0, sl, :],
                        preferred_element_type=jnp.float32)
    y = y + bb2_ref[0]
    out_ref[...] = _layernorm(y + x, g3_ref[0], b3_ref[0])[None]


# ----------------------------- wrapper ----------------------------------------

WEIGHT_ORDER = ["wq1", "wk1", "wv1", "wo1", "g1", "b1",
                "wq2", "wk2", "wv2", "wo2", "g2", "b2",
                "w1", "bb1", "w2", "bb2", "g3", "b3"]


def stack_layer_params(layers, n_head, d_k, d_v, compute_dtype=jnp.bfloat16):
    """Stack per-layer weights on a leading n_layers axis, reshape projections to
    head-major (H, D, d_k|d_v) / (H, d_v, D), fold 1/sqrt(d_k) into Wq, and cast
    matmul weights to bf16 (LayerNorm / bias params stay f32)."""
    scale = 1.0 / (d_k ** 0.5)
    d_model = layers[0]["wq1"].shape[0]

    def in_proj(w, dh, s=1.0):           # (D, H*dh) -> (H, D, dh)
        return jnp.transpose((w * s).reshape(d_model, n_head, dh),
                             (1, 0, 2)).astype(compute_dtype)

    def out_proj(w):                     # (H*d_v, D) -> (H, d_v, D)
        return w.reshape(n_head, d_v, d_model).astype(compute_dtype)

    per_layer = {
        "wq1": lambda l: in_proj(l["wq1"], d_k, scale),
        "wk1": lambda l: in_proj(l["wk1"], d_k),
        "wv1": lambda l: in_proj(l["wv1"], d_v),
        "wo1": lambda l: out_proj(l["wo1"]),
        "g1": lambda l: l["g1"], "b1": lambda l: l["b1"],
        "wq2": lambda l: in_proj(l["wq2"], d_k, scale),
        "wk2": lambda l: in_proj(l["wk2"], d_k),
        "wv2": lambda l: in_proj(l["wv2"], d_v),
        "wo2": lambda l: out_proj(l["wo2"]),
        "g2": lambda l: l["g2"], "b2": lambda l: l["b2"],
        "w1": lambda l: l["w1"].astype(compute_dtype), "bb1": lambda l: l["bb1"],
        "w2": lambda l: l["w2"].astype(compute_dtype), "bb2": lambda l: l["bb2"],
        "g3": lambda l: l["g3"], "b3": lambda l: l["b3"],
    }
    return {name: jnp.stack([per_layer[name](lyr) for lyr in layers])
            for name in WEIGHT_ORDER}


def fused_decoder_call(x0, enc, tbias, sbias, ln0_g, ln0_b, stacked,
                       n_layers, n_head, d_k, d_v):
    B, L, D = x0.shape
    S = enc.shape[1]
    d_inner = stacked["w1"].shape[-1]
    dff_tile = 512 if (d_inner > 512 and d_inner % 512 == 0) else d_inner

    def batch_spec(arr):                 # blocked per batch element, resident over layers
        rest = arr.shape[1:]
        nz = len(rest)
        return pl.BlockSpec((1,) + rest, lambda b, l, nz=nz: (b,) + (0,) * nz)

    def const_spec(arr):                 # fetched once (block index constant)
        nd = arr.ndim
        return pl.BlockSpec(arr.shape, lambda b, l, nd=nd: (0,) * nd)

    def layer_spec(arr):                 # streamed per layer (auto double-buffered)
        rest = arr.shape[1:]
        nz = len(rest)
        return pl.BlockSpec((1,) + rest, lambda b, l, nz=nz: (l,) + (0,) * nz)

    weights = [stacked[n] for n in WEIGHT_ORDER]
    in_specs = ([batch_spec(x0), batch_spec(enc), batch_spec(tbias), batch_spec(sbias),
                 const_spec(ln0_g), const_spec(ln0_b)]
                + [layer_spec(w) for w in weights])

    # Advisory cost estimate so XLA schedules surrounding glue ops sensibly.
    hdk, hdv = n_head * d_k, n_head * d_v
    flops_layer = 2 * (L * D * (2 * hdk + hdv)
                       + n_head * L * L * (d_k + d_v)
                       + L * hdv * D
                       + L * D * hdk + S * D * (hdk + hdv)
                       + n_head * L * S * (d_k + d_v)
                       + L * hdv * D
                       + 2 * L * D * d_inner)
    weight_bytes = sum(int(w.size) * w.dtype.itemsize for w in weights)
    cost = pl.CostEstimate(
        flops=int(B * n_layers * flops_layer),
        transcendentals=int(B * n_layers * n_head * (L * L + L * S)),
        bytes_accessed=int((x0.size + enc.size + tbias.size + sbias.size) * 4
                           + B * L * D * 4 + B * weight_bytes))

    kernel = functools.partial(fused_decoder_kernel, n_head, d_k, d_v, dff_tile)
    return pl.pallas_call(
        kernel,
        out_shape=jax.ShapeDtypeStruct((B, L, D), jnp.float32),
        grid=(B, n_layers),
        in_specs=in_specs,
        # constant block index over the (inner) layer axis -> activation resident in
        # VMEM across all layers, written back to HBM once per batch tile.
        out_specs=pl.BlockSpec((1, L, D), lambda b, l: (b, 0, 0)),
        compiler_params=pltpu.CompilerParams(
            dimension_semantics=("parallel", "arbitrary"),
            vmem_limit_bytes=48 * 1024 * 1024),
        cost_estimate=cost,
    )(x0, enc, tbias, sbias, ln0_g, ln0_b, *weights)


# ----------------------------- parameter init ---------------------------------

def sinusoid_pos_table(n_position, d_hid):
    def angle_vec(pos):
        return [pos / np.power(10000, 2 * (j // 2) / d_hid) for j in range(d_hid)]
    tbl = np.array([angle_vec(p) for p in range(n_position)])
    tbl[:, 0::2] = np.sin(tbl[:, 0::2])
    tbl[:, 1::2] = np.cos(tbl[:, 1::2])
    return jnp.asarray(tbl[None, ...], dtype=jnp.float32)   # (1, n_position, d_hid)


def init_decoder_params(key, n_trg_vocab, d_word_vec, n_layers, n_head,
                        d_k, d_v, d_model, d_inner, pad_idx, n_position):
    keys = jax.random.split(key, 1 + n_layers)
    emb = 0.02 * jax.random.normal(keys[0], (n_trg_vocab, d_word_vec), jnp.float32)
    emb = emb.at[pad_idx].set(0.0)   # nn.Embedding padding_idx row zeroed

    def lin(k, shape):
        return 0.02 * jax.random.normal(k, shape, jnp.float32)

    layers = []
    for i in range(n_layers):
        lk = jax.random.split(keys[1 + i], 10)
        layers.append(dict(
            wq1=lin(lk[0], (d_model, n_head * d_k)),
            wk1=lin(lk[1], (d_model, n_head * d_k)),
            wv1=lin(lk[2], (d_model, n_head * d_v)),
            wo1=lin(lk[3], (n_head * d_v, d_model)),
            g1=jnp.ones((1, d_model), jnp.float32), b1=jnp.zeros((1, d_model), jnp.float32),
            wq2=lin(lk[4], (d_model, n_head * d_k)),
            wk2=lin(lk[5], (d_model, n_head * d_k)),
            wv2=lin(lk[6], (d_model, n_head * d_v)),
            wo2=lin(lk[7], (n_head * d_v, d_model)),
            g2=jnp.ones((1, d_model), jnp.float32), b2=jnp.zeros((1, d_model), jnp.float32),
            w1=lin(lk[8], (d_model, d_inner)), bb1=jnp.zeros((1, d_inner), jnp.float32),
            w2=lin(lk[9], (d_inner, d_model)), bb2=jnp.zeros((1, d_model), jnp.float32),
            g3=jnp.ones((1, d_model), jnp.float32), b3=jnp.zeros((1, d_model), jnp.float32),
        ))

    return dict(
        emb=emb,
        pos_table=sinusoid_pos_table(n_position, d_word_vec),
        ln0_g=jnp.ones((1, d_model), jnp.float32),
        ln0_b=jnp.zeros((1, d_model), jnp.float32),
        layers=layers,
    )


# ----------------------------- decoder forward --------------------------------

def decoder_forward(trg_seq, trg_mask, enc_output, src_mask, params,
                    n_head, d_k, d_v, scale_emb=False):
    d_model = params["emb"].shape[1]
    n_layers = len(params["layers"])
    L = trg_seq.shape[1]

    # XLA glue: embedding gather, optional scale, positional encoding.
    x = jnp.take(params["emb"], trg_seq, axis=0)
    if scale_emb:
        x = x * (d_model ** 0.5)
    x = x + params["pos_table"][0, :L]
    # dropout = identity in eval mode

    # Additive masks computed once outside the kernel: 0 (keep) / -1e9 (masked), f32.
    tbias = (trg_mask - 1.0) * 1e9
    sbias = (src_mask - 1.0) * 1e9

    stacked = stack_layer_params(params["layers"], n_head, d_k, d_v)
    return fused_decoder_call(x, enc_output, tbias, sbias,
                              params["ln0_g"], params["ln0_b"],
                              stacked, n_layers, n_head, d_k, d_v)


# ----------------------------- main --------------------------------------------

if __name__ == "__main__":
    # small config consistent with the module's __init__
    n_trg_vocab, d_word_vec, d_model = 50, 32, 32
    n_layers, n_head, d_k, d_v = 2, 2, 16, 16
    d_inner, pad_idx, n_position = 64, 0, 200
    B, L, S = 2, 8, 12

    key = jax.random.PRNGKey(0)
    k_param, k_seq, k_enc = jax.random.split(key, 3)

    params = init_decoder_params(k_param, n_trg_vocab, d_word_vec, n_layers, n_head,
                                 d_k, d_v, d_model, d_inner, pad_idx, n_position)

    trg_seq = jax.random.randint(k_seq, (B, L), 1, n_trg_vocab, dtype=jnp.int32)
    trg_seq = trg_seq.at[1, -2:].set(pad_idx)                    # some padding in batch 1
    enc_output = jax.random.normal(k_enc, (B, S, d_model), jnp.float32)

    # masks as in the reference transformer: pad mask & subsequent (causal) mask
    pad_mask = (trg_seq != pad_idx).astype(jnp.float32)[:, None, :]        # (B, 1, L)
    causal = jnp.tril(jnp.ones((1, L, L), jnp.float32))                    # (1, L, L)
    trg_mask = pad_mask * causal                                           # (B, L, L)
    src_mask = jnp.ones((B, 1, S), jnp.float32)
    src_mask = src_mask.at[1, :, -3:].set(0.0)                             # some src padding

    out = decoder_forward(trg_seq, trg_mask, enc_output, src_mask, params,
                          n_head, d_k, d_v, scale_emb=False)
    out = jax.block_until_ready(out)
    assert out.shape == (B, L, d_model)
    assert bool(jnp.all(jnp.isfinite(out)))
    print("KERNEL_OK")
</pallas_src>

<mosaic_0001>
module attributes {stable_mosaic.version = 11 : i64} {
  func.func @fused_decoder_kernel(%arg0: i32, %arg1: i32, %arg2: memref<1x8x32xf32, #tpu.memory_space<vmem>>, %arg3: memref<1x12x32xf32, #tpu.memory_space<vmem>>, %arg4: memref<1x8x8xf32, #tpu.memory_space<vmem>>, %arg5: memref<1x1x12xf32, #tpu.memory_space<vmem>>, %arg6: memref<1x32xf32, #tpu.memory_space<vmem>>, %arg7: memref<1x32xf32, #tpu.memory_space<vmem>>, %arg8: memref<1x2x32x16xbf16, #tpu.memory_space<vmem>>, %arg9: memref<1x2x32x16xbf16, #tpu.memory_space<vmem>>, %arg10: memref<1x2x32x16xbf16, #tpu.memory_space<vmem>>, %arg11: memref<1x2x16x32xbf16, #tpu.memory_space<vmem>>, %arg12: memref<1x1x32xf32, #tpu.memory_space<vmem>>, %arg13: memref<1x1x32xf32, #tpu.memory_space<vmem>>, %arg14: memref<1x2x32x16xbf16, #tpu.memory_space<vmem>>, %arg15: memref<1x2x32x16xbf16, #tpu.memory_space<vmem>>, %arg16: memref<1x2x32x16xbf16, #tpu.memory_space<vmem>>, %arg17: memref<1x2x16x32xbf16, #tpu.memory_space<vmem>>, %arg18: memref<1x1x32xf32, #tpu.memory_space<vmem>>, %arg19: memref<1x1x32xf32, #tpu.memory_space<vmem>>, %arg20: memref<1x32x64xbf16, #tpu.memory_space<vmem>>, %arg21: memref<1x1x64xf32, #tpu.memory_space<vmem>>, %arg22: memref<1x64x32xbf16, #tpu.memory_space<vmem>>, %arg23: memref<1x1x32xf32, #tpu.memory_space<vmem>>, %arg24: memref<1x1x32xf32, #tpu.memory_space<vmem>>, %arg25: memref<1x1x32xf32, #tpu.memory_space<vmem>>, %arg26: memref<1x8x32xf32, #tpu.memory_space<vmem>>) attributes {dimension_semantics = [#tpu.dimension_semantics<parallel>, #tpu.dimension_semantics<arbitrary>], iteration_bounds = array<i64: 2, 2>, scalar_prefetch = 0 : i64, scratch_operands = 0 : i64, tpu.core_type = #tpu.core_type<tc>, window_params = [{transform_indices = @transform_0, window_bounds = array<i64: 1, 8, 32>}, {transform_indices = @transform_1, window_bounds = array<i64: 1, 12, 32>}, {transform_indices = @transform_2, window_bounds = array<i64: 1, 8, 8>}, {transform_indices = @transform_3, window_bounds = array<i64: 1, 1, 12>}, {pipeline_mode = #tpu.pipeline_mode<synchronous>, transform_indices = @transform_4, window_bounds = array<i64: 1, 32>}, {pipeline_mode = #tpu.pipeline_mode<synchronous>, transform_indices = @transform_5, window_bounds = array<i64: 1, 32>}, {transform_indices = @transform_6, window_bounds = array<i64: 1, 2, 32, 16>}, {transform_indices = @transform_7, window_bounds = array<i64: 1, 2, 32, 16>}, {transform_indices = @transform_8, window_bounds = array<i64: 1, 2, 32, 16>}, {transform_indices = @transform_9, window_bounds = array<i64: 1, 2, 16, 32>}, {transform_indices = @transform_10, window_bounds = array<i64: 1, 1, 32>}, {transform_indices = @transform_11, window_bounds = array<i64: 1, 1, 32>}, {transform_indices = @transform_12, window_bounds = array<i64: 1, 2, 32, 16>}, {transform_indices = @transform_13, window_bounds = array<i64: 1, 2, 32, 16>}, {transform_indices = @transform_14, window_bounds = array<i64: 1, 2, 32, 16>}, {transform_indices = @transform_15, window_bounds = array<i64: 1, 2, 16, 32>}, {transform_indices = @transform_16, window_bounds = array<i64: 1, 1, 32>}, {transform_indices = @transform_17, window_bounds = array<i64: 1, 1, 32>}, {transform_indices = @transform_18, window_bounds = array<i64: 1, 32, 64>}, {transform_indices = @transform_19, window_bounds = array<i64: 1, 1, 64>}, {transform_indices = @transform_20, window_bounds = array<i64: 1, 64, 32>}, {transform_indices = @transform_21, window_bounds = array<i64: 1, 1, 32>}, {transform_indices = @transform_22, window_bounds = array<i64: 1, 1, 32>}, {transform_indices = @transform_23, window_bounds = array<i64: 1, 1, 32>}, {transform_indices = @transform_24, window_bounds = array<i64: 1, 8, 32>}]} {
    %c0_i32 = arith.constant 0 : i32
    %0 = arith.cmpi eq, %arg1, %c0_i32 : i32
    %1 = arith.extui %0 : i1 to i32
    %c0_i32_0 = arith.constant 0 : i32
    %2 = arith.cmpi ne, %1, %c0_i32_0 : i32
    scf.if %2 {
      %c0_113 = arith.constant 0 : index
      %c0_114 = arith.constant 0 : index
      %c0_115 = arith.constant 0 : index
      %192 = vector.load %arg2[%c0_113, %c0_114, %c0_115] : memref<1x8x32xf32, #tpu.memory_space<vmem>>, vector<1x8x32xf32>
      %c0_116 = arith.constant 0 : index
      %c0_117 = arith.constant 0 : index
      %193 = vector.load %arg6[%c0_116, %c0_117] : memref<1x32xf32, #tpu.memory_space<vmem>>, vector<1x32xf32>
      %c0_118 = arith.constant 0 : index
      %c0_119 = arith.constant 0 : index
      %194 = vector.load %arg7[%c0_118, %c0_119] : memref<1x32xf32, #tpu.memory_space<vmem>>, vector<1x32xf32>
      %cst_120 = arith.constant dense<0.000000e+00> : vector<1x8xf32>
      %195 = vector.multi_reduction <add>, %192, %cst_120 [2] : vector<1x8x32xf32> to vector<1x8xf32>
      %196 = vector.shape_cast %195 : vector<1x8xf32> to vector<1x8x1xf32>
      %cst_121 = arith.constant 3.200000e+01 : f32
      %197 = vector.broadcast %cst_121 : f32 to vector<1x8x1xf32>
      %198 = arith.divf %196, %197 : vector<1x8x1xf32>
      %199 = vector.broadcast %198 : vector<1x8x1xf32> to vector<1x8x32xf32>
      %200 = arith.subf %192, %199 : vector<1x8x32xf32>
      %201 = arith.mulf %200, %200 : vector<1x8x32xf32>
      %cst_122 = arith.constant dense<0.000000e+00> : vector<1x8xf32>
      %202 = vector.multi_reduction <add>, %201, %cst_122 [2] : vector<1x8x32xf32> to vector<1x8xf32>
      %203 = vector.shape_cast %202 : vector<1x8xf32> to vector<1x8x1xf32>
      %cst_123 = arith.constant 3.200000e+01 : f32
      %204 = vector.broadcast %cst_123 : f32 to vector<1x8x1xf32>
      %205 = arith.divf %203, %204 : vector<1x8x1xf32>
      %206 = vector.broadcast %198 : vector<1x8x1xf32> to vector<1x8x32xf32>
      %207 = arith.subf %192, %206 : vector<1x8x32xf32>
      %cst_124 = arith.constant 9.99999997E-7 : f32
      %208 = vector.broadcast %cst_124 : f32 to vector<1x8x1xf32>
      %209 = arith.addf %205, %208 : vector<1x8x1xf32>
      %210 = math.rsqrt %209 : vector<1x8x1xf32>
      %211 = vector.broadcast %210 : vector<1x8x1xf32> to vector<1x8x32xf32>
      %212 = arith.mulf %207, %211 : vector<1x8x32xf32>
      %213 = vector.shape_cast %193 : vector<1x32xf32> to vector<1x1x32xf32>
      %214 = vector.broadcast %213 : vector<1x1x32xf32> to vector<1x8x32xf32>
      %215 = arith.mulf %212, %214 : vector<1x8x32xf32>
      %216 = vector.shape_cast %194 : vector<1x32xf32> to vector<1x1x32xf32>
      %217 = vector.broadcast %216 : vector<1x1x32xf32> to vector<1x8x32xf32>
      %218 = arith.addf %215, %217 : vector<1x8x32xf32>
      %c0_125 = arith.constant 0 : index
      %c0_126 = arith.constant 0 : index
      %c0_127 = arith.constant 0 : index
      %219 = vector.load %arg26[%c0_125, %c0_126, %c0_127] : memref<1x8x32xf32, #tpu.memory_space<vmem>>, vector<1x8x32xf32>
      tpu.vector_store %arg26[%c0_125, %c0_126, %c0_127], %218 {strides = array<i32>} : memref<1x8x32xf32, #tpu.memory_space<vmem>>, vector<1x8x32xf32>,
    } else {
    }
    %c0 = arith.constant 0 : index
    %c0_1 = arith.constant 0 : index
    %c0_2 = arith.constant 0 : index
    %3 = vector.load %arg26[%c0, %c0_1, %c0_2] : memref<1x8x32xf32, #tpu.memory_space<vmem>>, vector<1x8x32xf32>
    %4 = vector.shape_cast %3 : vector<1x8x32xf32> to vector<8x32xf32>
    %c0_3 = arith.constant 0 : index
    %c0_4 = arith.constant 0 : index
    %c0_5 = arith.constant 0 : index
    %5 = vector.load %arg4[%c0_3, %c0_4, %c0_5] : memref<1x8x8xf32, #tpu.memory_space<vmem>>, vector<1x8x8xf32>
    %6 = vector.shape_cast %5 : vector<1x8x8xf32> to vector<8x8xf32>
    %c0_6 = arith.constant 0 : index
    %c0_7 = arith.constant 0 : index
    %c0_8 = arith.constant 0 : index
    %7 = vector.load %arg5[%c0_6, %c0_7, %c0_8] : memref<1x1x12xf32, #tpu.memory_space<vmem>>, vector<1x1x12xf32>
    %8 = vector.shape_cast %7 : vector<1x1x12xf32> to vector<1x12xf32>
    %9 = arith.truncf %4 : vector<8x32xf32> to vector<8x32xbf16>
    %10 = vector.shape_cast %6 : vector<8x8xf32> to vector<1x8x8xf32>
    %c0_9 = arith.constant 0 : index
    %c0_10 = arith.constant 0 : index
    %c0_11 = arith.constant 0 : index
    %c0_12 = arith.constant 0 : index
    %11 = vector.load %arg8[%c0_9, %c0_10, %c0_11, %c0_12] : memref<1x2x32x16xbf16, #tpu.memory_space<vmem>>, vector<1x2x32x16xbf16>
    %12 = vector.shape_cast %11 : vector<1x2x32x16xbf16> to vector<2x32x16xbf16>
    %c0_13 = arith.constant 0 : index
    %c0_14 = arith.constant 0 : index
    %c0_15 = arith.constant 0 : index
    %c0_16 = arith.constant 0 : index
    %13 = vector.load %arg9[%c0_13, %c0_14, %c0_15, %c0_16] : memref<1x2x32x16xbf16, #tpu.memory_space<vmem>>, vector<1x2x32x16xbf16>
    %14 = vector.shape_cast %13 : vector<1x2x32x16xbf16> to vector<2x32x16xbf16>
    %c0_17 = arith.constant 0 : index
    %c0_18 = arith.constant 0 : index
    %c0_19 = arith.constant 0 : index
    %c0_20 = arith.constant 0 : index
    %15 = vector.load %arg10[%c0_17, %c0_18, %c0_19, %c0_20] : memref<1x2x32x16xbf16, #tpu.memory_space<vmem>>, vector<1x2x32x16xbf16>
    %16 = vector.shape_cast %15 : vector<1x2x32x16xbf16> to vector<2x32x16xbf16>
    %c0_21 = arith.constant 0 : index
    %c0_22 = arith.constant 0 : index
    %c0_23 = arith.constant 0 : index
    %c0_24 = arith.constant 0 : index
    %17 = vector.load %arg11[%c0_21, %c0_22, %c0_23, %c0_24] : memref<1x2x16x32xbf16, #tpu.memory_space<vmem>>, vector<1x2x16x32xbf16>
    %18 = vector.shape_cast %17 : vector<1x2x16x32xbf16> to vector<2x16x32xbf16>
    %19 = vector.shape_cast %9 : vector<8x32xbf16> to vector<1x8x32xbf16>
    %20 = vector.shape_cast %19 : vector<1x8x32xbf16> to vector<1x8x32xbf16>
    %21 = vector.broadcast %20 : vector<1x8x32xbf16> to vector<2x8x32xbf16>
    %cst = arith.constant dense<0.000000e+00> : vector<2x8x16xf32>
    %22 = tpu.matmul %21, %12, %cst {dimension_numbers = #tpu.dot_dimension_numbers<[2], [1], [1], [2], [0, 0, 0, 1, 1, 2], [0], [0]>} : vector<2x8x32xbf16>, vector<2x32x16xbf16>, vector<2x8x16xf32> -> vector<2x8x16xf32>
    %cst_25 = arith.constant dense<0.000000e+00> : vector<2x8x16xf32>
    %23 = tpu.matmul %21, %14, %cst_25 {dimension_numbers = #tpu.dot_dimension_numbers<[2], [1], [1], [2], [0, 0, 0, 1, 1, 2], [0], [0]>} : vector<2x8x32xbf16>, vector<2x32x16xbf16>, vector<2x8x16xf32> -> vector<2x8x16xf32>
    %cst_26 = arith.constant dense<0.000000e+00> : vector<2x8x16xf32>
    %24 = tpu.matmul %21, %16, %cst_26 {dimension_numbers = #tpu.dot_dimension_numbers<[2], [1], [1], [2], [0, 0, 0, 1, 1, 2], [0], [0]>} : vector<2x8x32xbf16>, vector<2x32x16xbf16>, vector<2x8x16xf32> -> vector<2x8x16xf32>
    %25 = arith.truncf %22 : vector<2x8x16xf32> to vector<2x8x16xbf16>
    %26 = arith.truncf %23 : vector<2x8x16xf32> to vector<2x8x16xbf16>
    %cst_27 = arith.constant dense<0.000000e+00> : vector<2x8x8xf32>
    %27 = tpu.matmul %25, %26, %cst_27 {dimension_numbers = #tpu.dot_dimension_numbers<[2], [2], [1], [1], [0, 0, 0, 1, 1, 1], [0], [0]>} : vector<2x8x16xbf16>, vector<2x8x16xbf16>, vector<2x8x8xf32> -> vector<2x8x8xf32>
    %28 = vector.broadcast %10 : vector<1x8x8xf32> to vector<2x8x8xf32>
    %29 = arith.addf %27, %28 : vector<2x8x8xf32>
    %cst_28 = arith.constant dense<0xFF800000> : vector<2x8xf32>
    %30 = vector.multi_reduction <maximumf>, %29, %cst_28 [2] : vector<2x8x8xf32> to vector<2x8xf32>
    %31 = vector.shape_cast %30 : vector<2x8xf32> to vector<2x8x1xf32>
    %32 = vector.broadcast %31 : vector<2x8x1xf32> to vector<2x8x8xf32>
    %33 = arith.subf %29, %32 : vector<2x8x8xf32>
    %34 = math.exp %33 : vector<2x8x8xf32>
    %cst_29 = arith.constant dense<0.000000e+00> : vector<2x8xf32>
    %35 = vector.multi_reduction <add>, %34, %cst_29 [2] : vector<2x8x8xf32> to vector<2x8xf32>
    %36 = vector.shape_cast %35 : vector<2x8xf32> to vector<2x8x1xf32>
    %37 = tpu.reciprocal %36 {approx = true} : vector<2x8x1xf32> -> vector<2x8x1xf32>
    %38 = vector.broadcast %37 : vector<2x8x1xf32> to vector<2x8x8xf32>
    %39 = arith.mulf %34, %38 : vector<2x8x8xf32>
    %40 = arith.truncf %39 : vector<2x8x8xf32> to vector<2x8x8xbf16>
    %41 = arith.truncf %24 : vector<2x8x16xf32> to vector<2x8x16xbf16>
    %cst_30 = arith.constant dense<0.000000e+00> : vector<2x8x16xf32>
    %42 = tpu.matmul %40, %41, %cst_30 {dimension_numbers = #tpu.dot_dimension_numbers<[2], [1], [1], [2], [0, 0, 0, 1, 1, 2], [0], [0]>} : vector<2x8x8xbf16>, vector<2x8x16xbf16>, vector<2x8x16xf32> -> vector<2x8x16xf32>
    %43 = arith.truncf %42 : vector<2x8x16xf32> to vector<2x8x16xbf16>
    %cst_31 = arith.constant dense<0.000000e+00> : vector<2x8x32xf32>
    %44 = tpu.matmul %43, %18, %cst_31 {dimension_numbers = #tpu.dot_dimension_numbers<[2], [1], [1], [2], [0, 0, 0, 1, 1, 2], [0], [0]>} : vector<2x8x16xbf16>, vector<2x16x32xbf16>, vector<2x8x32xf32> -> vector<2x8x32xf32>
    %cst_32 = arith.constant dense<0.000000e+00> : vector<8x32xf32>
    %45 = vector.multi_reduction <add>, %44, %cst_32 [0] : vector<2x8x32xf32> to vector<8x32xf32>
    %46 = arith.addf %45, %4 : vector<8x32xf32>
    %c0_33 = arith.constant 0 : index
    %c0_34 = arith.constant 0 : index
    %c0_35 = arith.constant 0 : index
    %47 = vector.load %arg12[%c0_33, %c0_34, %c0_35] : memref<1x1x32xf32, #tpu.memory_space<vmem>>, vector<1x1x32xf32>
    %48 = vector.shape_cast %47 : vector<1x1x32xf32> to vector<1x32xf32>
    %c0_36 = arith.constant 0 : index
    %c0_37 = arith.constant 0 : index
    %c0_38 = arith.constant 0 : index
    %49 = vector.load %arg13[%c0_36, %c0_37, %c0_38] : memref<1x1x32xf32, #tpu.memory_space<vmem>>, vector<1x1x32xf32>
    %50 = vector.shape_cast %49 : vector<1x1x32xf32> to vector<1x32xf32>
    %cst_39 = arith.constant dense<0.000000e+00> : vector<8xf32>
    %51 = vector.multi_reduction <add>, %46, %cst_39 [1] : vector<8x32xf32> to vector<8xf32>
    %52 = vector.shape_cast %51 : vector<8xf32> to vector<8x1xf32>
    %cst_40 = arith.constant 3.200000e+01 : f32
    %53 = vector.broadcast %cst_40 : f32 to vector<8x1xf32>
    %54 = arith.divf %52, %53 : vector<8x1xf32>
    %55 = vector.broadcast %54 : vector<8x1xf32> to vector<8x32xf32>
    %56 = arith.subf %46, %55 : vector<8x32xf32>
    %57 = arith.mulf %56, %56 : vector<8x32xf32>
    %cst_41 = arith.constant dense<0.000000e+00> : vector<8xf32>
    %58 = vector.multi_reduction <add>, %57, %cst_41 [1] : vector<8x32xf32> to vector<8xf32>
    %59 = vector.shape_cast %58 : vector<8xf32> to vector<8x1xf32>
    %cst_42 = arith.constant 3.200000e+01 : f32
    %60 = vector.broadcast %cst_42 : f32 to vector<8x1xf32>
    %61 = arith.divf %59, %60 : vector<8x1xf32>
    %62 = vector.broadcast %54 : vector<8x1xf32> to vector<8x32xf32>
    %63 = arith.subf %46, %62 : vector<8x32xf32>
    %cst_43 = arith.constant 9.99999997E-7 : f32
    %64 = vector.broadcast %cst_43 : f32 to vector<8x1xf32>
    %65 = arith.addf %61, %64 : vector<8x1xf32>
    %66 = math.rsqrt %65 : vector<8x1xf32>
    %67 = vector.broadcast %66 : vector<8x1xf32> to vector<8x32xf32>
    %68 = arith.mulf %63, %67 : vector<8x32xf32>
    %69 = vector.broadcast %48 : vector<1x32xf32> to vector<8x32xf32>
    %70 = arith.mulf %68, %69 : vector<8x32xf32>
    %71 = vector.broadcast %50 : vector<1x32xf32> to vector<8x32xf32>
    %72 = arith.addf %70, %71 : vector<8x32xf32>
    %c0_44 = arith.constant 0 : index
    %c0_45 = arith.constant 0 : index
    %c0_46 = arith.constant 0 : index
    %73 = vector.load %arg3[%c0_44, %c0_45, %c0_46] : memref<1x12x32xf32, #tpu.memory_space<vmem>>, vector<1x12x32xf32>
    %74 = vector.shape_cast %73 : vector<1x12x32xf32> to vector<12x32xf32>
    %75 = arith.truncf %74 : vector<12x32xf32> to vector<12x32xbf16>
    %76 = arith.truncf %72 : vector<8x32xf32> to vector<8x32xbf16>
    %77 = vector.shape_cast %8 : vector<1x12xf32> to vector<1x1x12xf32>
    %c0_47 = arith.constant 0 : index
    %c0_48 = arith.constant 0 : index
    %c0_49 = arith.constant 0 : index
    %c0_50 = arith.constant 0 : index
    %78 = vector.load %arg14[%c0_47, %c0_48, %c0_49, %c0_50] : memref<1x2x32x16xbf16, #tpu.memory_space<vmem>>, vector<1x2x32x16xbf16>
    %79 = vector.shape_cast %78 : vector<1x2x32x16xbf16> to vector<2x32x16xbf16>
    %c0_51 = arith.constant 0 : index
    %c0_52 = arith.constant 0 : index
    %c0_53 = arith.constant 0 : index
    %c0_54 = arith.constant 0 : index
    %80 = vector.load %arg15[%c0_51, %c0_52, %c0_53, %c0_54] : memref<1x2x32x16xbf16, #tpu.memory_space<vmem>>, vector<1x2x32x16xbf16>
    %81 = vector.shape_cast %80 : vector<1x2x32x16xbf16> to vector<2x32x16xbf16>
    %c0_55 = arith.constant 0 : index
    %c0_56 = arith.constant 0 : index
    %c0_57 = arith.constant 0 : index
    %c0_58 = arith.constant 0 : index
    %82 = vector.load %arg16[%c0_55, %c0_56, %c0_57, %c0_58] : memref<1x2x32x16xbf16, #tpu.memory_space<vmem>>, vector<1x2x32x16xbf16>
    %83 = vector.shape_cast %82 : vector<1x2x32x16xbf16> to vector<2x32x16xbf16>
    %c0_59 = arith.constant 0 : index
    %c0_60 = arith.constant 0 : index
    %c0_61 = arith.constant 0 : index
    %c0_62 = arith.constant 0 : index
    %84 = vector.load %arg17[%c0_59, %c0_60, %c0_61, %c0_62] : memref<1x2x16x32xbf16, #tpu.memory_space<vmem>>, vector<1x2x16x32xbf16>
    %85 = vector.shape_cast %84 : vector<1x2x16x32xbf16> to vector<2x16x32xbf16>
    %86 = vector.shape_cast %76 : vector<8x32xbf16> to vector<1x8x32xbf16>
    %87 = vector.shape_cast %86 : vector<1x8x32xbf16> to vector<1x8x32xbf16>
    %88 = vector.broadcast %87 : vector<1x8x32xbf16> to vector<2x8x32xbf16>
    %89 = vector.shape_cast %75 : vector<12x32xbf16> to vector<1x12x32xbf16>
    %90 = vector.shape_cast %89 : vector<1x12x32xbf16> to vector<1x12x32xbf16>
    %91 = vector.broadcast %90 : vector<1x12x32xbf16> to vector<2x12x32xbf16>
    %cst_63 = arith.constant dense<0.000000e+00> : vector<2x8x16xf32>
    %92 = tpu.matmul %88, %79, %cst_63 {dimension_numbers = #tpu.dot_dimension_numbers<[2], [1], [1], [2], [0, 0, 0, 1, 1, 2], [0], [0]>} : vector<2x8x32xbf16>, vector<2x32x16xbf16>, vector<2x8x16xf32> -> vector<2x8x16xf32>
    %cst_64 = arith.constant dense<0.000000e+00> : vector<2x12x16xf32>
    %93 = tpu.matmul %91, %81, %cst_64 {dimension_numbers = #tpu.dot_dimension_numbers<[2], [1], [1], [2], [0, 0, 0, 1, 1, 2], [0], [0]>} : vector<2x12x32xbf16>, vector<2x32x16xbf16>, vector<2x12x16xf32> -> vector<2x12x16xf32>
    %cst_65 = arith.constant dense<0.000000e+00> : vector<2x12x16xf32>
    %94 = tpu.matmul %91, %83, %cst_65 {dimension_numbers = #tpu.dot_dimension_numbers<[2], [1], [1], [2], [0, 0, 0, 1, 1, 2], [0], [0]>} : vector<2x12x32xbf16>, vector<2x32x16xbf16>, vector<2x12x16xf32> -> vector<2x12x16xf32>
    %95 = arith.truncf %92 : vector<2x8x16xf32> to vector<2x8x16xbf16>
    %96 = arith.truncf %93 : vector<2x12x16xf32> to vector<2x12x16xbf16>
    %cst_66 = arith.constant dense<0.000000e+00> : vector<2x8x12xf32>
    %97 = tpu.matmul %95, %96, %cst_66 {dimension_numbers = #tpu.dot_dimension_numbers<[2], [2], [1], [1], [0, 0, 0, 1, 1, 1], [0], [0]>} : vector<2x8x16xbf16>, vector<2x12x16xbf16>, vector<2x8x12xf32> -> vector<2x8x12xf32>
    %98 = vector.broadcast %77 : vector<1x1x12xf32> to vector<2x8x12xf32>
    %99 = arith.addf %97, %98 : vector<2x8x12xf32>
    %cst_67 = arith.constant dense<0xFF800000> : vector<2x8xf32>
    %100 = vector.multi_reduction <maximumf>, %99, %cst_67 [2] : vector<2x8x12xf32> to vector<2x8xf32>
    %101 = vector.shape_cast %100 : vector<2x8xf32> to vector<2x8x1xf32>
    %102 = vector.broadcast %101 : vector<2x8x1xf32> to vector<2x8x12xf32>
    %103 = arith.subf %99, %102 : vector<2x8x12xf32>
    %104 = math.exp %103 : vector<2x8x12xf32>
    %cst_68 = arith.constant dense<0.000000e+00> : vector<2x8xf32>
    %105 = vector.multi_reduction <add>, %104, %cst_68 [2] : vector<2x8x12xf32> to vector<2x8xf32>
    %106 = vector.shape_cast %105 : vector<2x8xf32> to vector<2x8x1xf32>
    %107 = tpu.reciprocal %106 {approx = true} : vector<2x8x1xf32> -> vector<2x8x1xf32>
    %108 = vector.broadcast %107 : vector<2x8x1xf32> to vector<2x8x12xf32>
    %109 = arith.mulf %104, %108 : vector<2x8x12xf32>
    %110 = arith.truncf %109 : vector<2x8x12xf32> to vector<2x8x12xbf16>
    %111 = arith.truncf %94 : vector<2x12x16xf32> to vector<2x12x16xbf16>
    %cst_69 = arith.constant dense<0.000000e+00> : vector<2x8x16xf32>
    %112 = tpu.matmul %110, %111, %cst_69 {dimension_numbers = #tpu.dot_dimension_numbers<[2], [1], [1], [2], [0, 0, 0, 1, 1, 2], [0], [0]>} : vector<2x8x12xbf16>, vector<2x12x16xbf16>, vector<2x8x16xf32> -> vector<2x8x16xf32>
    %113 = arith.truncf %112 : vector<2x8x16xf32> to vector<2x8x16xbf16>
    %cst_70 = arith.constant dense<0.000000e+00> : vector<2x8x32xf32>
    %114 = tpu.matmul %113, %85, %cst_70 {dimension_numbers = #tpu.dot_dimension_numbers<[2], [1], [1], [2], [0, 0, 0, 1, 1, 2], [0], [0]>} : vector<2x8x16xbf16>, vector<2x16x32xbf16>, vector<2x8x32xf32> -> vector<2x8x32xf32>
    %cst_71 = arith.constant dense<0.000000e+00> : vector<8x32xf32>
    %115 = vector.multi_reduction <add>, %114, %cst_71 [0] : vector<2x8x32xf32> to vector<8x32xf32>
    %116 = arith.addf %115, %72 : vector<8x32xf32>
    %c0_72 = arith.constant 0 : index
    %c0_73 = arith.constant 0 : index
    %c0_74 = arith.constant 0 : index
    %117 = vector.load %arg18[%c0_72, %c0_73, %c0_74] : memref<1x1x32xf32, #tpu.memory_space<vmem>>, vector<1x1x32xf32>
    %118 = vector.shape_cast %117 : vector<1x1x32xf32> to vector<1x32xf32>
    %c0_75 = arith.constant 0 : index
    %c0_76 = arith.constant 0 : index
    %c0_77 = arith.constant 0 : index
    %119 = vector.load %arg19[%c0_75, %c0_76, %c0_77] : memref<1x1x32xf32, #tpu.memory_space<vmem>>, vector<1x1x32xf32>
    %120 = vector.shape_cast %119 : vector<1x1x32xf32> to vector<1x32xf32>
    %cst_78 = arith.constant dense<0.000000e+00> : vector<8xf32>
    %121 = vector.multi_reduction <add>, %116, %cst_78 [1] : vector<8x32xf32> to vector<8xf32>
    %122 = vector.shape_cast %121 : vector<8xf32> to vector<8x1xf32>
    %cst_79 = arith.constant 3.200000e+01 : f32
    %123 = vector.broadcast %cst_79 : f32 to vector<8x1xf32>
    %124 = arith.divf %122, %123 : vector<8x1xf32>
    %125 = vector.broadcast %124 : vector<8x1xf32> to vector<8x32xf32>
    %126 = arith.subf %116, %125 : vector<8x32xf32>
    %127 = arith.mulf %126, %126 : vector<8x32xf32>
    %cst_80 = arith.constant dense<0.000000e+00> : vector<8xf32>
    %128 = vector.multi_reduction <add>, %127, %cst_80 [1] : vector<8x32xf32> to vector<8xf32>
    %129 = vector.shape_cast %128 : vector<8xf32> to vector<8x1xf32>
    %cst_81 = arith.constant 3.200000e+01 : f32
    %130 = vector.broadcast %cst_81 : f32 to vector<8x1xf32>
    %131 = arith.divf %129, %130 : vector<8x1xf32>
    %132 = vector.broadcast %124 : vector<8x1xf32> to vector<8x32xf32>
    %133 = arith.subf %116, %132 : vector<8x32xf32>
    %cst_82 = arith.constant 9.99999997E-7 : f32
    %134 = vector.broadcast %cst_82 : f32 to vector<8x1xf32>
    %135 = arith.addf %131, %134 : vector<8x1xf32>
    %136 = math.rsqrt %135 : vector<8x1xf32>
    %137 = vector.broadcast %136 : vector<8x1xf32> to vector<8x32xf32>
    %138 = arith.mulf %133, %137 : vector<8x32xf32>
    %139 = vector.broadcast %118 : vector<1x32xf32> to vector<8x32xf32>
    %140 = arith.mulf %138, %139 : vector<8x32xf32>
    %141 = vector.broadcast %120 : vector<1x32xf32> to vector<8x32xf32>
    %142 = arith.addf %140, %141 : vector<8x32xf32>
    %143 = arith.truncf %142 : vector<8x32xf32> to vector<8x32xbf16>
    %cst_83 = arith.constant 0.000000e+00 : f32
    %144 = vector.broadcast %cst_83 : f32 to vector<8x32xf32>
    %c0_84 = arith.constant 0 : index
    %c0_85 = arith.constant 0 : index
    %c0_86 = arith.constant 0 : index
    %145 = vector.load %arg20[%c0_84, %c0_85, %c0_86] : memref<1x32x64xbf16, #tpu.memory_space<vmem>>, vector<1x32x64xbf16>
    %146 = vector.shape_cast %145 : vector<1x32x64xbf16> to vector<32x64xbf16>
    %cst_87 = arith.constant dense<0.000000e+00> : vector<8x64xf32>
    %147 = tpu.matmul %143, %146, %cst_87 {dimension_numbers = #tpu.dot_dimension_numbers<[1], [0], [0], [1], [0, 0, 1, 1], [], []>} : vector<8x32xbf16>, vector<32x64xbf16>, vector<8x64xf32> -> vector<8x64xf32>
    %c0_88 = arith.constant 0 : index
    %c0_89 = arith.constant 0 : index
    %c0_90 = arith.constant 0 : index
    %148 = vector.load %arg21[%c0_88, %c0_89, %c0_90] : memref<1x1x64xf32, #tpu.memory_space<vmem>>, vector<1x1x64xf32>
    %149 = vector.shape_cast %148 : vector<1x1x64xf32> to vector<1x64xf32>
    %150 = vector.broadcast %149 : vector<1x64xf32> to vector<8x64xf32>
    %151 = arith.addf %147, %150 : vector<8x64xf32>
    %cst_91 = arith.constant 0.000000e+00 : f32
    %152 = vector.broadcast %cst_91 : f32 to vector<8x64xf32>
    %153 = arith.maximumf %151, %152 : vector<8x64xf32>
    %154 = arith.truncf %153 : vector<8x64xf32> to vector<8x64xbf16>
    %c0_92 = arith.constant 0 : index
    %c0_93 = arith.constant 0 : index
    %c0_94 = arith.constant 0 : index
    %155 = vector.load %arg22[%c0_92, %c0_93, %c0_94] : memref<1x64x32xbf16, #tpu.memory_space<vmem>>, vector<1x64x32xbf16>
    %156 = vector.shape_cast %155 : vector<1x64x32xbf16> to vector<64x32xbf16>
    %cst_95 = arith.constant dense<0.000000e+00> : vector<8x32xf32>
    %157 = tpu.matmul %154, %156, %cst_95 {dimension_numbers = #tpu.dot_dimension_numbers<[1], [0], [0], [1], [0, 0, 1, 1], [], []>} : vector<8x64xbf16>, vector<64x32xbf16>, vector<8x32xf32> -> vector<8x32xf32>
    %158 = arith.addf %144, %157 : vector<8x32xf32>
    %c0_96 = arith.constant 0 : index
    %c0_97 = arith.constant 0 : index
    %c0_98 = arith.constant 0 : index
    %159 = vector.load %arg23[%c0_96, %c0_97, %c0_98] : memref<1x1x32xf32, #tpu.memory_space<vmem>>, vector<1x1x32xf32>
    %160 = vector.shape_cast %159 : vector<1x1x32xf32> to vector<1x32xf32>
    %161 = vector.broadcast %160 : vector<1x32xf32> to vector<8x32xf32>
    %162 = arith.addf %158, %161 : vector<8x32xf32>
    %163 = arith.addf %162, %142 : vector<8x32xf32>
    %c0_99 = arith.constant 0 : index
    %c0_100 = arith.constant 0 : index
    %c0_101 = arith.constant 0 : index
    %164 = vector.load %arg24[%c0_99, %c0_100, %c0_101] : memref<1x1x32xf32, #tpu.memory_space<vmem>>, vector<1x1x32xf32>
    %165 = vector.shape_cast %164 : vector<1x1x32xf32> to vector<1x32xf32>
    %c0_102 = arith.constant 0 : index
    %c0_103 = arith.constant 0 : index
    %c0_104 = arith.constant 0 : index
    %166 = vector.load %arg25[%c0_102, %c0_103, %c0_104] : memref<1x1x32xf32, #tpu.memory_space<vmem>>, vector<1x1x32xf32>
    %167 = vector.shape_cast %166 : vector<1x1x32xf32> to vector<1x32xf32>
    %cst_105 = arith.constant dense<0.000000e+00> : vector<8xf32>
    %168 = vector.multi_reduction <add>, %163, %cst_105 [1] : vector<8x32xf32> to vector<8xf32>
    %169 = vector.shape_cast %168 : vector<8xf32> to vector<8x1xf32>
    %cst_106 = arith.constant 3.200000e+01 : f32
    %170 = vector.broadcast %cst_106 : f32 to vector<8x1xf32>
    %171 = arith.divf %169, %170 : vector<8x1xf32>
    %172 = vector.broadcast %171 : vector<8x1xf32> to vector<8x32xf32>
    %173 = arith.subf %163, %172 : vector<8x32xf32>
    %174 = arith.mulf %173, %173 : vector<8x32xf32>
    %cst_107 = arith.constant dense<0.000000e+00> : vector<8xf32>
    %175 = vector.multi_reduction <add>, %174, %cst_107 [1] : vector<8x32xf32> to vector<8xf32>
    %176 = vector.shape_cast %175 : vector<8xf32> to vector<8x1xf32>
    %cst_108 = arith.constant 3.200000e+01 : f32
    %177 = vector.broadcast %cst_108 : f32 to vector<8x1xf32>
    %178 = arith.divf %176, %177 : vector<8x1xf32>
    %179 = vector.broadcast %171 : vector<8x1xf32> to vector<8x32xf32>
    %180 = arith.subf %163, %179 : vector<8x32xf32>
    %cst_109 = arith.constant 9.99999997E-7 : f32
    %181 = vector.broadcast %cst_109 : f32 to vector<8x1xf32>
    %182 = arith.addf %178, %181 : vector<8x1xf32>
    %183 = math.rsqrt %182 : vector<8x1xf32>
    %184 = vector.broadcast %183 : vector<8x1xf32> to vector<8x32xf32>
    %185 = arith.mulf %180, %184 : vector<8x32xf32>
    %186 = vector.broadcast %165 : vector<1x32xf32> to vector<8x32xf32>
    %187 = arith.mulf %185, %186 : vector<8x32xf32>
    %188 = vector.broadcast %167 : vector<1x32xf32> to vector<8x32xf32>
    %189 = arith.addf %187, %188 : vector<8x32xf32>
    %190 = vector.shape_cast %189 : vector<8x32xf32> to vector<1x8x32xf32>
    %c0_110 = arith.constant 0 : index
    %c0_111 = arith.constant 0 : index
    %c0_112 = arith.constant 0 : index
    %191 = vector.load %arg26[%c0_110, %c0_111, %c0_112] : memref<1x8x32xf32, #tpu.memory_space<vmem>>, vector<1x8x32xf32>
    tpu.vector_store %arg26[%c0_110, %c0_111, %c0_112], %190 {strides = array<i32>} : memref<1x8x32xf32, #tpu.memory_space<vmem>>, vector<1x8x32xf32>,
    return
  }
  func.func @transform_0(%arg0: i32, %arg1: i32) -> (i32, i32, i32) {
    %c0_i32 = arith.constant 0 : i32
    %c0_i32_0 = arith.constant 0 : i32
    %c0_i32_1 = arith.constant 0 : i32
    return %arg0, %c0_i32, %c0_i32_0 : i32, i32, i32
  }
  func.func @transform_1(%arg0: i32, %arg1: i32) -> (i32, i32, i32) {
    %c0_i32 = arith.constant 0 : i32
    %c0_i32_0 = arith.constant 0 : i32
    %c0_i32_1 = arith.constant 0 : i32
    return %arg0, %c0_i32, %c0_i32_0 : i32, i32, i32
  }
  func.func @transform_2(%arg0: i32, %arg1: i32) -> (i32, i32, i32) {
    %c0_i32 = arith.constant 0 : i32
    %c0_i32_0 = arith.constant 0 : i32
    %c0_i32_1 = arith.constant 0 : i32
    return %arg0, %c0_i32, %c0_i32_0 : i32, i32, i32
  }
  func.func @transform_3(%arg0: i32, %arg1: i32) -> (i32, i32, i32) {
    %c0_i32 = arith.constant 0 : i32
    %c0_i32_0 = arith.constant 0 : i32
    %c0_i32_1 = arith.constant 0 : i32
    return %arg0, %c0_i32, %c0_i32_0 : i32, i32, i32
  }
  func.func @transform_4(%arg0: i32, %arg1: i32) -> (i32, i32) {
    %c0_i32 = arith.constant 0 : i32
    %c0_i32_0 = arith.constant 0 : i32
    %c0_i32_1 = arith.constant 0 : i32
    return %c0_i32, %c0_i32_0 : i32, i32
  }
  func.func @transform_5(%arg0: i32, %arg1: i32) -> (i32, i32) {
    %c0_i32 = arith.constant 0 : i32
    %c0_i32_0 = arith.constant 0 : i32
    %c0_i32_1 = arith.constant 0 : i32
    return %c0_i32, %c0_i32_0 : i32, i32
  }
  func.func @transform_6(%arg0: i32, %arg1: i32) -> (i32, i32, i32, i32) {
    %c0_i32 = arith.constant 0 : i32
    %c0_i32_0 = arith.constant 0 : i32
    %c0_i32_1 = arith.constant 0 : i32
    %c0_i32_2 = arith.constant 0 : i32
    return %arg1, %c0_i32, %c0_i32_0, %c0_i32_1 : i32, i32, i32, i32
  }
  func.func @transform_7(%arg0: i32, %arg1: i32) -> (i32, i32, i32, i32) {
    %c0_i32 = arith.constant 0 : i32
    %c0_i32_0 = arith.constant 0 : i32
    %c0_i32_1 = arith.constant 0 : i32
    %c0_i32_2 = arith.constant 0 : i32
    return %arg1, %c0_i32, %c0_i32_0, %c0_i32_1 : i32, i32, i32, i32
  }
  func.func @transform_8(%arg0: i32, %arg1: i32) -> (i32, i32, i32, i32) {
    %c0_i32 = arith.constant 0 : i32
    %c0_i32_0 = arith.constant 0 : i32
    %c0_i32_1 = arith.constant 0 : i32
    %c0_i32_2 = arith.constant 0 : i32
    return %arg1, %c0_i32, %c0_i32_0, %c0_i32_1 : i32, i32, i32, i32
  }
  func.func @transform_9(%arg0: i32, %arg1: i32) -> (i32, i32, i32, i32) {
    %c0_i32 = arith.constant 0 : i32
    %c0_i32_0 = arith.constant 0 : i32
    %c0_i32_1 = arith.constant 0 : i32
    %c0_i32_2 = arith.constant 0 : i32
    return %arg1, %c0_i32, %c0_i32_0, %c0_i32_1 : i32, i32, i32, i32
  }
  func.func @transform_10(%arg0: i32, %arg1: i32) -> (i32, i32, i32) {
    %c0_i32 = arith.constant 0 : i32
    %c0_i32_0 = arith.constant 0 : i32
    %c0_i32_1 = arith.constant 0 : i32
    return %arg1, %c0_i32, %c0_i32_0 : i32, i32, i32
  }
  func.func @transform_11(%arg0: i32, %arg1: i32) -> (i32, i32, i32) {
    %c0_i32 = arith.constant 0 : i32
    %c0_i32_0 = arith.constant 0 : i32
    %c0_i32_1 = arith.constant 0 : i32
    return %arg1, %c0_i32, %c0_i32_0 : i32, i32, i32
  }
  func.func @transform_12(%arg0: i32, %arg1: i32) -> (i32, i32, i32, i32) {
    %c0_i32 = arith.constant 0 : i32
    %c0_i32_0 = arith.constant 0 : i32
    %c0_i32_1 = arith.constant 0 : i32
    %c0_i32_2 = arith.constant 0 : i32
    return %arg1, %c0_i32, %c0_i32_0, %c0_i32_1 : i32, i32, i32, i32
  }
  func.func @transform_13(%arg0: i32, %arg1: i32) -> (i32, i32, i32, i32) {
    %c0_i32 = arith.constant 0 : i32
    %c0_i32_0 = arith.constant 0 : i32
    %c0_i32_1 = arith.constant 0 : i32
    %c0_i32_2 = arith.constant 0 : i32
    return %arg1, %c0_i32, %c0_i32_0, %c0_i32_1 : i32, i32, i32, i32
  }
  func.func @transform_14(%arg0: i32, %arg1: i32) -> (i32, i32, i32, i32) {
    %c0_i32 = arith.constant 0 : i32
    %c0_i32_0 = arith.constant 0 : i32
    %c0_i32_1 = arith.constant 0 : i32
    %c0_i32_2 = arith.constant 0 : i32
    return %arg1, %c0_i32, %c0_i32_0, %c0_i32_1 : i32, i32, i32, i32
  }
  func.func @transform_15(%arg0: i32, %arg1: i32) -> (i32, i32, i32, i32) {
    %c0_i32 = arith.constant 0 : i32
    %c0_i32_0 = arith.constant 0 : i32
    %c0_i32_1 = arith.constant 0 : i32
    %c0_i32_2 = arith.constant 0 : i32
    return %arg1, %c0_i32, %c0_i32_0, %c0_i32_1 : i32, i32, i32, i32
  }
  func.func @transform_16(%arg0: i32, %arg1: i32) -> (i32, i32, i32) {
    %c0_i32 = arith.constant 0 : i32
    %c0_i32_0 = arith.constant 0 : i32
    %c0_i32_1 = arith.constant 0 : i32
    return %arg1, %c0_i32, %c0_i32_0 : i32, i32, i32
  }
  func.func @transform_17(%arg0: i32, %arg1: i32) -> (i32, i32, i32) {
    %c0_i32 = arith.constant 0 : i32
    %c0_i32_0 = arith.constant 0 : i32
    %c0_i32_1 = arith.constant 0 : i32
    return %arg1, %c0_i32, %c0_i32_0 : i32, i32, i32
  }
  func.func @transform_18(%arg0: i32, %arg1: i32) -> (i32, i32, i32) {
    %c0_i32 = arith.constant 0 : i32
    %c0_i32_0 = arith.constant 0 : i32
    %c0_i32_1 = arith.constant 0 : i32
    return %arg1, %c0_i32, %c0_i32_0 : i32, i32, i32
  }
  func.func @transform_19(%arg0: i32, %arg1: i32) -> (i32, i32, i32) {
    %c0_i32 = arith.constant 0 : i32
    %c0_i32_0 = arith.constant 0 : i32
    %c0_i32_1 = arith.constant 0 : i32
    return %arg1, %c0_i32, %c0_i32_0 : i32, i32, i32
  }
  func.func @transform_20(%arg0: i32, %arg1: i32) -> (i32, i32, i32) {
    %c0_i32 = arith.constant 0 : i32
    %c0_i32_0 = arith.constant 0 : i32
    %c0_i32_1 = arith.constant 0 : i32
    return %arg1, %c0_i32, %c0_i32_0 : i32, i32, i32
  }
  func.func @transform_21(%arg0: i32, %arg1: i32) -> (i32, i32, i32) {
    %c0_i32 = arith.constant 0 : i32
    %c0_i32_0 = arith.constant 0 : i32
    %c0_i32_1 = arith.constant 0 : i32
    return %arg1, %c0_i32, %c0_i32_0 : i32, i32, i32
  }
  func.func @transform_22(%arg0: i32, %arg1: i32) -> (i32, i32, i32) {
    %c0_i32 = arith.constant 0 : i32
    %c0_i32_0 = arith.constant 0 : i32
    %c0_i32_1 = arith.constant 0 : i32
    return %arg1, %c0_i32, %c0_i32_0 : i32, i32, i32
  }
  func.func @transform_23(%arg0: i32, %arg1: i32) -> (i32, i32, i32) {
    %c0_i32 = arith.constant 0 : i32
    %c0_i32_0 = arith.constant 0 : i32
    %c0_i32_1 = arith.constant 0 : i32
    return %arg1, %c0_i32, %c0_i32_0 : i32, i32, i32
  }
  func.func @transform_24(%arg0: i32, %arg1: i32) -> (i32, i32, i32) {
    %c0_i32 = arith.constant 0 : i32
    %c0_i32_0 = arith.constant 0 : i32
    %c0_i32_1 = arith.constant 0 : i32
    return %arg0, %c0_i32, %c0_i32_0 : i32, i32, i32
  }
}

</mosaic_0001>

<bundles_post_ra>
// kernel: tpu_custom_call.1
= control target key start
LH: loop header
LB: loop body
LE: loop exit
PB: predicated region body
PF: predicated region fallthrough
CT: control target
= control target key end

     0   :  { %s4254_s0 = inlined_call_operand.vmem [shape: f32[2,8,32], index: 0, kind: input, shape index: {}]   ;;  %s4255_s1 = inlined_call_operand.vmem [shape: f32[2,12,32], index: 1, kind: input, shape index: {}]   ;;  %s4256_s2 = inlined_call_operand.vmem [shape: f32[2,8,8], index: 2, kind: input, shape index: {}]   ;;  %s4257_s3 = inlined_call_operand.vmem [shape: f32[2,1,12], index: 3, kind: input, shape index: {}]   ;;  %s4258_s4 = inlined_call_operand.vmem [shape: f32[1,32], index: 4, kind: input, shape index: {}]   ;;  %s4259_s5 = inlined_call_operand.vmem [shape: f32[1,32], index: 5, kind: input, shape index: {}]   ;;  %s4260_s6 = inlined_call_operand.vmem [shape: bf16[2,2,32,16], index: 6, kind: input, shape index: {}]   ;;  %s4261_s7 = inlined_call_operand.vmem [shape: bf16[2,2,32,16], index: 7, kind: input, shape index: {}]   ;;  %s4262_s8 = inlined_call_operand.vmem [shape: bf16[2,2,32,16], index: 8, kind: input, shape index: {}]   ;;  %s4263_s9 = inlined_call_operand.vmem [shape: bf16[2,2,16,32], index: 9, kind: input, shape index: {}]   ;;  %s4264_s10 = inlined_call_operand.vmem [shape: f32[2,1,32], index: 10, kind: input, shape index: {}]   ;;  %s4265_s11 = inlined_call_operand.vmem [shape: f32[2,1,32], index: 11, kind: input, shape index: {}]   ;;  %s4266_s12 = inlined_call_operand.vmem [shape: bf16[2,2,32,16], index: 12, kind: input, shape index: {}]   ;;  %s4267_s13 = inlined_call_operand.vmem [shape: bf16[2,2,32,16], index: 13, kind: input, shape index: {}]   ;;  %s4268_s14 = inlined_call_operand.vmem [shape: bf16[2,2,32,16], index: 14, kind: input, shape index: {}]   ;;  %s4269_s15 = inlined_call_operand.vmem [shape: bf16[2,2,16,32], index: 15, kind: input, shape index: {}]   ;;  %s4270_s16 = inlined_call_operand.vmem [shape: f32[2,1,32], index: 16, kind: input, shape index: {}]   ;;  %s4271_s17 = inlined_call_operand.vmem [shape: f32[2,1,32], index: 17, kind: input, shape index: {}]   ;;  %s4272_s18 = inlined_call_operand.vmem [shape: bf16[2,32,64], index: 18, kind: input, shape index: {}]   ;;  %s4273_s19 = inlined_call_operand.vmem [shape: f32[2,1,64], index: 19, kind: input, shape index: {}]   ;;  %s4274_s20 = inlined_call_operand.vmem [shape: bf16[2,64,32], index: 20, kind: input, shape index: {}]   ;;  %s4275_s21 = inlined_call_operand.vmem [shape: f32[2,1,32], index: 21, kind: input, shape index: {}]   ;;  %s4276_s22 = inlined_call_operand.vmem [shape: f32[2,1,32], index: 22, kind: input, shape index: {}]   ;;  %s4277_s23 = inlined_call_operand.vmem [shape: f32[2,1,32], index: 23, kind: input, shape index: {}]   ;;  %s4278_s24 = inlined_call_operand.hbm [shape: f32[2,8,32], index: 24, kind: output, shape index: {}]  }
   0x1   :  { %4300 = sst [smem:[#allocation24_spill]] %s4254_s0 }
   0x2   :  { %4301 = sst [smem:[#allocation25_spill]] %s4255_s1 }
   0x3   :  { %4302 = sst [smem:[#allocation26_spill]] %s4256_s2 }
   0x4   :  { %4303 = sst [smem:[#allocation27_spill]] %s4257_s3 }
   0x5   :  { %4304 = sst [smem:[#allocation28_spill]] %s4258_s4 }
   0x6   :  { %4305 = sst [smem:[#allocation29_spill]] %s4259_s5 }
   0x7   :  { %4306 = sst [smem:[#allocation30_spill]] %s4260_s6 }
   0x8   :  { %4307 = sst [smem:[#allocation31_spill]] %s4261_s7 }
   0x9   :  { %4308 = sst [smem:[#allocation32_spill]] %s4262_s8 }
   0xa   :  { %4309 = sst [smem:[#allocation33_spill]] %s4263_s9 }
   0xb   :  { %4310 = sst [smem:[#allocation34_spill]] %s4264_s10 }
   0xc   :  { %4311 = sst [smem:[#allocation35_spill]] %s4265_s11 }
   0xd   :  { %4312 = sst [smem:[#allocation36_spill]] %s4266_s12 }
   0xe   :  { %4313 = sst [smem:[#allocation37_spill]] %s4267_s13 }
   0xf   :  { %4314 = sst [smem:[#allocation38_spill]] %s4268_s14 }
  0x10   :  { %4315 = sst [smem:[#allocation39_spill]] %s4269_s15 }
  0x11   :  { %4316 = sst [smem:[#allocation40_spill]] %s4270_s16 }
  0x12   :  { %4317 = sst [smem:[#allocation41_spill]] %s4271_s17 }
  0x13   :  { %4318 = sst [smem:[#allocation42_spill]] %s4272_s18 }
  0x14   :  { %4319 = sst [smem:[#allocation43_spill]] %s4273_s19 }
  0x15   :  { %4320 = sst [smem:[#allocation44_spill]] %s4274_s20 }
  0x16   :  { %4321 = sst [smem:[#allocation45_spill]] %s4275_s21 }
  0x17   :  { %4322 = sst [smem:[#allocation46_spill]] %s4276_s22 }
  0x18   :  { %4323 = sst [smem:[#allocation47_spill]] %s4277_s23 }
  0x19   :  { %4324 = sst [smem:[#allocation48_spill]] %s4278_s24 }
  0x1a   :  { %29 = vsyncpa [#allocation3], 0 }
  0x1b   :  { %31 = vsyncpa [#allocation3 + $0x1], 0  ;;  %s3772_s5 = smov 0   ;;  %s3774_s26 = smov 0  }
  0x1c   :  { %s3776_s27 = smov 0   ;;  %s3778_s28 = smov 0  }
  0x1d   :  { %s3780_s6 = smov 0   ;;  %s3782_s2 = smov 0  }
  0x1e   :  { %s3784_s29 = smov 0   ;;  %s3786_s0 = smov 0  }
  0x1f LB: > { %4325 = sst [smem:[#allocation5_spill]] %s3614_s5  ;;  %s3046_s7 = sadd.s32 4294967295, %s3642_s0   ;;  %s3642_s0 = sphi %s3786_s0, %s37_s0   ;;  %s3638_s29 = sphi %s3784_s29, %s4405_s29   ;;  %s3634_s2 = sphi %s3782_s2, %s4404_s2   ;;  %s3630_s6 = sphi %s3780_s6, %s4403_s6   ;;  %s3626_s28 = sphi %s3778_s28, %s4402_s28   ;;  %s3622_s27 = sphi %s3776_s27, %s4401_s27   ;;  %s3618_s26 = sphi %s3774_s26, %s4400_s26   ;;  %s3614_s5 = sphi %s3772_s5, %s4399_s5  }
  0x20   : > { %4326 = sst [smem:[#allocation6_spill]] %s3618_s26  ;;  %s3047_s30 = sadd.s32 4294967294, %s3642_s0  }
  0x21   : > { %4327 = sst [smem:[#allocation7_spill]] %s3622_s27  ;;  %s46_s3 = sadd.s32 1, %s3634_s2 }
  0x22   : > { %4328 = sst [smem:[#allocation8_spill]] %s3626_s28  ;;  %p47_p0 = scmp.ge.s32.totalorder %s46_s3, 2 }
  0x23   : > { %4329 = sst [smem:[#allocation9_spill]] %s3630_s6  ;;  %s49_s25 = sadd.s32 1, %s3638_s29 }
  0x24   : > { %4330 = sst [smem:[#allocation10_spill]] %s3634_s2  ;;  %p680_p1 = scmp.ne.s32.totalorder %s3622_s27, %s3618_s26 }
  0x25   : > { %4331 = sst [smem:[#allocation11_spill]] %s3638_s29  ;;  %p681_p2 = scmp.eq.s32.totalorder %s3046_s7, 3 }
  0x26   : > { %4332 = sst [smem:[#allocation12_spill]] %s3642_s0  ;;  %s4407_s3 = smov (%p47_p0, %s46_s3), 0 }
  0x27   : > { %4333 = sst [smem:[#allocation13_spill]] %s4407_s3  ;;  %s4409_s25 = smov (!%p47_p0, %s49_s25), %s3638_s29 }
  0x28   : > { %p3821_p3 = por %p681_p2, %p680_p1  ;;  %p686_p4 = scmp.ne.s32.totalorder %s3618_s26, %s3614_s5 }
  0x29   : > { %p51_p5 = scmp.ge.s32.totalorder %s4409_s25, 2  ;;  %p687_p6 = scmp.eq.s32.totalorder %s3047_s30, 3 }
  0x2a   : > { %s4334_s8 = scalar_select %p3821_p3, 1, 0 }
  0x2b   : > { %p3050_p7 = scmp.ge.s32.totalorder %s3642_s0, 1  ;;  %p867_p8 = scmp.lt.s32.totalorder %s3642_s0, 5 }
  0x2c   : > { %4335 = sst [smem:[#allocation14_spill]] %s4334_s8  ;;  %s4411_s25 = smov (%p51_p5, %s4409_s25), 0 }
  0x2d   : > { %4336 = sst [smem:[#allocation15_spill]] %s4411_s25  ;;  %p3831_p9 = por %p687_p6, %p686_p4 }
  0x2e   : > { %p868_p10 = pnand %p3050_p7, %p867_p8  ;;  %s667_s1 = ssub.s32 %s3638_s29, %s4411_s25 }
  0x2f   : > { %s4337_s4 = scalar_select %p3831_p9, 1, 0 }
  0x30   : > { %s670_s7 = sadd.s32 1, %s3622_s27  ;;  %p668_p11 = scmp.eq.s32.totalorder %s667_s1, 0 }
  0x31   : > { %4338 = sst [smem:[#allocation16_spill]] %s4337_s4  ;;  %871 = sbr.rel (%p868_p10) target bundleno = 3986 (0xf92), region = 116 }
  0x32   : > { %s3839_s3 = scalar_select %p668_p11, %s3622_s27, %s670_s7  }
  0x34   : > { %4339 = sst [smem:[#allocation17_spill]] %s3839_s3 }
  0x36   : > { %s4285_s30 = sand.u32 1, %s3618_s26   ;;  %p1018_p12 = scmp.lt.s32.totalorder %s3630_s6, 1 }
  0x37   : > { %s3845_s2 = sshll.u32 %s4285_s30, 3  ;;  %p1034_p13 = scmp.lt.s32.totalorder %s3626_s28, 1 }
  0x38   : > { %s3849_s4 = scalar_select %p1018_p12, %s3630_s6, 1 }
  0x39   : > { %s3852_s1 = scalar_select %p1034_p13, %s3626_s28, 1 }
  0x3a   : > { %4340 = sst [smem:[#allocation18_spill]] %s3849_s4  ;;  %s3052_s7 = sshll.u32 %s3849_s4, 3 }
  0x3b   : > { %s3152_s25 = sshll.u32 %s3849_s4, 4  ;;  %s4341_s27 = sld [smem:[#allocation24_spill]] }
  0x3c   : > { %s4342_s24 = sld [smem:[#allocation25_spill]]  ;;  %s3153_s18 = sshll.u32 %s3852_s1, 5 }
  0x3d   : > { %s4344_s28 = sld [smem:[#allocation26_spill]]  ;;  %s3156_s29 = sshll.u32 %s3852_s1, 4 }
  0x3e   : > { %s4346_s17 = sld [smem:[#allocation30_spill]] }
  0x3f   : > { %s4347_s30 = sld [smem:[#allocation31_spill]] }
  0x40   : > { %s4349_s9 = sld [smem:[#allocation33_spill]] }
  0x41   : > { %s1021_s5 = scalar_lea.vmem %s4341_s27, %s3052_s7  ;;  %s4353_s12 = sld [smem:[#allocation36_spill]] }
  0x42   : > { %s3862_s8 = scalar_lea.vmem %s4342_s24, %s3152_s25  ;;  %s4354_s13 = sld [smem:[#allocation37_spill]] }
  0x43   : > { %4343 = sst [smem:[#allocation19_spill]] %s3862_s8  ;;  %s3867_s23 = scalar_lea.vmem %s4344_s28, %s3052_s7 }
  0x44   : > { %s3878_s0 = scalar_lea.vmem %s4346_s17, %s3153_s18  ;;  %s4348_s7 = sld [smem:[#allocation32_spill]] }
  0x45   : > { %s3883_s26 = scalar_lea.vmem %s4347_s30, %s3153_s18  ;;  %s4355_s14 = sld [smem:[#allocation38_spill]] }
  0x46   : > { %s3893_s27 = scalar_lea.vmem %s4349_s9, %s3156_s29  ;;  %s4357_s15 = sld [smem:[#allocation39_spill]] }
  0x47   : > { %4350 = sst [smem:[#allocation20_spill]] %s3893_s27  ;;  %s3906_s28 = scalar_lea.vmem %s4353_s12, %s3153_s18 }
  0x48   : > { %s3911_s21 = scalar_lea.vmem %s4354_s13, %s3153_s18  ;;  %s4361_s11 = sld [smem:[#allocation42_spill]] }
  0x49   : > { %s4365_s8 = sld [smem:[#allocation45_spill]] }
  0x4a   : > { %s3888_s20 = scalar_lea.vmem %s4348_s7, %s3153_s18  ;;  %s4366_s4 = sld [smem:[#allocation46_spill]] }
  0x4b   : > { %s3916_s27 = scalar_lea.vmem %s4355_s14, %s3153_s18  ;;  %s4363_s14 = sld [smem:[#allocation43_spill]] }
  0x4c   : > { %4356 = sst [smem:[#allocation21_spill]] %s3916_s27  ;;  %s3921_s24 = scalar_lea.vmem %s4357_s15, %s3156_s29 }
  0x4d   : > { %4358 = sst [smem:[#allocation22_spill]] %s3921_s24 }
  0x4e   : > { %s3934_s10 = scalar_lea.vmem %s4361_s11, %s3156_s29  ;;  %s4364_s15 = sld [smem:[#allocation44_spill]] }
  0x4f   : > { %4362 = sst [smem:[#allocation23_spill]] %s3934_s10  ;;  %s1101_s16 = scalar_lea.vmem %s4365_s8, %s3852_s1 }
  0x50   : > { %s1104_s6 = scalar_lea.vmem %s4366_s4, %s3852_s1  ;;  %s4367_s29 = sld [smem:[#allocation47_spill]] }
  0x51   : > { %s1093_s27 = scalar_lea.vmem %s4363_s14, %s3852_s1  ;;  %s3958_s10 = scalar_lea.vmem [#allocation2], %s3845_s2 }
  0x52   : > { %s4368_s14 = sld [smem:[#allocation8_spill]] }
  0x54   : > { %s3943_s24 = scalar_lea.vmem %s4364_s15, %s3153_s18 }
  0x56   : > { %s1107_s7 = scalar_lea.vmem %s4367_s29, %s3852_s1 }
  0x58   : > { %p3076_p0 = scmp.ne.s32.totalorder %s4368_s14, 0 }
  0x59   : > { %s4370_s9 = sld [smem:[#allocation29_spill]] (!%p3076_p0) }
  0x5a   : > { %1112 = sbr.rel (%p3076_p0) target bundleno = 405 (0x195), region = 120 }
  0x5f   : > { %v1113_v0 = vld [vmem:[%s1021_s5] sm:$0xff]  ;;  %vm1116_vm0 = vcmask 261120   ;;  %s4369_s5 = sld [smem:[#allocation28_spill]] }
  0x60   : > { %v1117_v1 = vsel %vm1116_vm0, %v1113_v0, 0.0  ;;  %v3078_v13 = vld [vmem:[%s4370_s9] ss:$0 sm:$0xff] }
  0x61   : > { %1118 = vadd.xlane.f32.xlu0 %v1117_v1 }
  0x65   : > { %v3077_v11 = vld [vmem:[%s4369_s5] ss:$0 sm:$0xff] }
  0xea   : > { %v1119_v2 = vpop.xlane.xlu0 %1118 }
  0xeb   : > { %v1121_v3 = vmul.f32 0.03125, %v1119_v2 }
  0xed   : > { %v1122_v4 = vsub.f32 %v1113_v0, %v1121_v3 }
  0xef   : > { %v1123_v5 = vmul.f32 %v1122_v4, %v1122_v4 }
  0xf1   : > { %v1124_v6 = vsel %vm1116_vm0, %v1123_v5, 0.0 }
  0xf2   : > { %1125 = vadd.xlane.f32.xlu0 %v1124_v6 }
 0x17b   : > { %v1126_v7 = vpop.xlane.xlu0 %1125 }
 0x17c   : > { %v1127_v8 = vmul.f32 0.03125, %v1126_v7 }
 0x17e   : > { %v1128_v9 = vadd.f32 1e-06, %v1127_v8 }
 0x180   : > { %3492 = vrsqrt.f32 %v1128_v9 }
 0x18d   : > { %v3493_v10 = vpop.eup %3492 }
 0x18e   : > { %v1130_v12 = vmul.f32 %v3493_v10, %v1122_v4 }
 0x190   : > { %v1137_v14 = vmul.f32 %v3077_v11, %v1130_v12 }
 0x192   : > { %v1144_v15 = vadd.f32 %v3078_v13, %v1137_v14 }
 0x194   : > { %1145 = vst.msk [vmem:[%s3958_s10] sm:$0xff] %vm1116_vm0, %v1144_v15 }
 0x195 PF: > { %v3494_v16 = vld [vmem:[%s3878_s0 + $0x8] sm:$0xff]   ;;  %v3644_v17 = vmov 0.0   ;;  %v3495_v18 = vld [vmem:[%s3878_s0 + $0x18] sm:$0xff]   ;;  %v3496_v19 = vld [vmem:[%s3878_s0] sm:$0xff]   ;;  %vm3645_vm1 = vmmov 0   ;;  %vm1190_vm2 = vcmask 261120  }
 0x196   : > { %3231 = vmatprep.subr.bf16.mxu0 %v3644_v17  ;;  %3239 = vmatprep.subr.bf16.mxu1 %v3644_v17  ;;  %v3497_v20 = vld [vmem:[%s3878_s0 + $0x10] sm:$0xff]   ;;  %v3498_v23 = vld [vmem:[%s3883_s26 + $0x8] sm:$0xff]   ;;  %v3499_v24 = vld [vmem:[%s3883_s26 + $0x18] sm:$0xff]   ;;  %vm1498_vm3 = vcmask 130048   ;;  %vm1621_vm4 = vcmask 1043456   ;;  %vm1591_vm5 = vcmask 64512  }
 0x197   : > { %3232 = vmatpush3.bf16.msra.mxu0 %v3494_v16  ;;  %3235 = vmatprep.mubr.msk.bf16.mxu0 %vm3645_vm1, %v3644_v17  ;;  %v3500_v25 = vld [vmem:[%s3883_s26] sm:$0xff]   ;;  %v3501_v26 = vld [vmem:[%s3883_s26 + $0x10] sm:$0xff]   ;;  %v3502_v27 = vld [vmem:[%s3888_s20 + $0x8] sm:$0xff]   ;;  %s4372_s0 = sld [smem:[#allocation19_spill]]  ;;  %vm2331_vm6 = vcmask 1045504   ;;  %vm2301_vm7 = vcmask 97280  }
 0x198   : > { %3240 = vmatpush3.bf16.msra.mxu1 %v3495_v18  ;;  %3233 = vmatprep.subr.bf16.mxu0 %v3644_v17  ;;  %v3503_v28 = vld [vmem:[%s3888_s20] sm:$0xff]   ;;  %v3504_v29 = vld [vmem:[%s3888_s20 + $0x18] sm:$0xff]   ;;  %v3505_v30 = vld [vmem:[%s3888_s20 + $0x10] sm:$0xff]   ;;  %s4375_s30 = sld [smem:[#allocation35_spill]]  ;;  %vm2662_vm8 = vcmask 523264  }
 0x199   : > { %3241 = vmatprep.subr.bf16.mxu1 %v3644_v17  ;;  %3243 = vmatprep.mubr.msk.bf16.mxu1 %vm3645_vm1, %v3644_v17  ;;  %v1147_v1 = vld [vmem:[%s3867_s23] sm:$0xff]  ;;  %s4371_s23 = sld [smem:[#allocation20_spill]] }
 0x19a   : > { %s4377_s19 = sld [smem:[#allocation21_spill]] }
 0x19b   : > { %v3984_v21 = vld [vmem:[%s3958_s10] sm:$0xff]  ;;  %3234 = vmatpush3.bf16.msra.mxu0 %v3496_v19  ;;  %s4379_s13 = sld [smem:[#allocation27_spill]] }
 0x19c   : > { %v1149_v22 = vpack.c.bf16 %v3984_v21, %v3984_v21  ;;  %3242 = vmatpush3.bf16.msra.mxu1 %v3497_v20  ;;  %3247 = vmatprep.subr.bf16.mxu0 %v3644_v17  ;;  %s4381_s29 = sld [smem:[#allocation22_spill]] }
 0x19d   : > { %3255 = vmatprep.subr.bf16.mxu1 %v3644_v17  ;;  %s4382_s14 = sld [smem:[#allocation23_spill]] }
 0x19e   : > { %3236 = vmatmul.mubr.msk.bf16.vlgmr.msra.gmra.mxu0 %vm1190_vm2, %v1149_v22  ;;  %s4376_s25 = scalar_lea.vmem %s4375_s30, %s3852_s1  ;;  %s4383_s5 = sld [smem:[#allocation40_spill]] }
 0x19f   : > { %3244 = vmatmul.mubr.msk.bf16.vlgmr.msra.gmra.mxu1 %vm1190_vm2, %v1149_v22  ;;  %3248 = vmatpush3.bf16.msra.mxu0 %v3498_v23  ;;  %s4394_s15 = sld [smem:[#allocation48_spill]] }
 0x1a0   : > { %3256 = vmatpush3.bf16.msra.mxu1 %v3499_v24  ;;  %3249 = vmatprep.subr.bf16.mxu0 %v3644_v17 }
 0x1a1   : > { %3257 = vmatprep.subr.bf16.mxu1 %v3644_v17  ;;  %3251 = vmatprep.mubr.msk.bf16.mxu0 %vm3645_vm1, %v3644_v17 }
 0x1a2   : > { %3259 = vmatprep.mubr.msk.bf16.mxu1 %vm3645_vm1, %v3644_v17 }
 0x1a3   : > { %3250 = vmatpush3.bf16.msra.mxu0 %v3500_v25 }
 0x1a4   : > { %3258 = vmatpush3.bf16.msra.mxu1 %v3501_v26  ;;  %3263 = vmatprep.subr.bf16.mxu0 %v3644_v17  ;;  %s4384_s2 = scalar_lea.vmem %s4383_s5, %s3852_s1 }
 0x1a5   : > { %3271 = vmatprep.subr.bf16.mxu1 %v3644_v17 }
 0x1a6   : > { %3252 = vmatmul.mubr.msk.bf16.vlgmr.msra.gmra.mxu0 %vm1190_vm2, %v1149_v22 }
 0x1a7   : > { %3260 = vmatmul.mubr.msk.bf16.vlgmr.msra.gmra.mxu1 %vm1190_vm2, %v1149_v22  ;;  %3264 = vmatpush3.bf16.msra.mxu0 %v3502_v27 }
 0x1a8   : > { %3265 = vmatprep.subr.bf16.mxu0 %v3644_v17  ;;  %3267 = vmatprep.mubr.msk.bf16.mxu0 %vm3645_vm1, %v3644_v17 }
 0x1a9   : > { %3275 = vmatprep.mubr.msk.bf16.mxu1 %vm3645_vm1, %v3644_v17  ;;  %3272 = vmatpush3.bf16.msra.mxu1 %v3504_v29 }
 0x1aa   : > { %3273 = vmatprep.subr.bf16.mxu1 %v3644_v17 }
 0x1ab   : > { %3266 = vmatpush3.bf16.msra.mxu0 %v3503_v28 }
 0x1ac   : > { %3279 = vmatprep.subr.bf16.mxu0 %v3644_v17 }
 0x1ad   : > { %3274 = vmatpush3.bf16.msra.mxu1 %v3505_v30 }
 0x1ae   : > { %3268 = vmatmul.mubr.msk.bf16.vlgmr.msra.gmra.mxu0 %vm1190_vm2, %v1149_v22  ;;  %3285 = vmatprep.subr.bf16.mxu1 %v3644_v17 }
 0x1af   : > { %3281 = vmatprep.mubr.msk.bf16.mxu0 %vm3645_vm1, %v3644_v17 }
 0x1b0   : > { %3276 = vmatmul.mubr.msk.bf16.vlgmr.msra.gmra.mxu1 %vm1190_vm2, %v1149_v22 }
 0x1b1   : > { %3287 = vmatprep.mubr.msk.bf16.mxu1 %vm3645_vm1, %v3644_v17 }
 0x25e   : > { %v1228_v31 = vpop.f32.mrf.mxu0 }
 0x25f   : > { %v1280_v32 = vpop.f32.mrf.mxu1  ;;  %v1494_v51 = vpack.c.bf16 %v1228_v31, %v1228_v31 }
 0x260   : > { %v3237_v33 = vpop.f32.mrf.mxu0  ;;  %v1495_v52 = vpack.c.bf16 %v1280_v32, %v1280_v32 }
 0x261   : > { %v3245_v34 = vpop.f32.mrf.mxu1 }
 0x262   : > { %v1231_v35 = vpop.f32.mrf.mxu0  ;;  %v3506_v34 = vld [vmem:[%s4371_s23] sm:$0xff]  }
 0x263   : > { %v1283_v36 = vpop.f32.mrf.mxu1  ;;  %v3507_v35 = vld [vmem:[%s4371_s23 + $0x8] sm:$0xff]   ;;  %s4385_s23 = sld [smem:[#allocation41_spill]] }
 0x264   : > { %v3238_v37 = vpop.f32.mrf.mxu0 }
 0x265   : > { %v3246_v38 = vpop.f32.mrf.mxu1 }
 0x266   : > { %v1332_v39 = vpop.f32.mrf.mxu0 }
 0x267   : > { %v1496_v40 = vpack.c.bf16 %v1332_v39, %v1332_v39  ;;  %v1384_v41 = vpop.f32.mrf.mxu1 }
 0x268   : > { %v1497_v42 = vpack.c.bf16 %v1384_v41, %v1384_v41  ;;  %v3253_v43 = vpop.f32.mrf.mxu0 }
 0x269   : > { %v1503_v44 = vsel %vm1498_vm3, %v1496_v40, 0  ;;  %v3261_v45 = vpop.f32.mrf.mxu1 }
 0x26a   : > { %v1549_v46 = vsel %vm1498_vm3, %v1497_v42, 0  ;;  %v1335_v47 = vpop.f32.mrf.mxu0  ;;  %3280 = vmatpush3.bf16.xpose.msra.mxu0 %v1503_v44 }
 0x26b   : > { %v1387_v48 = vpop.f32.mrf.mxu1  ;;  %3286 = vmatpush3.bf16.xpose.msra.mxu1 %v1549_v46  ;;  %3291 = vmatprep.subr.bf16.mxu0 %v3644_v17 }
 0x26c   : > { %v3254_v49 = vpop.f32.mrf.mxu0  ;;  %3297 = vmatprep.subr.bf16.mxu1 %v3644_v17 }
 0x26d   : > { %v3262_v50 = vpop.f32.mrf.mxu1 }
 0x26e   : > { %v1436_v53 = vpop.f32.mrf.mxu0 }
 0x26f   : > { %v1616_v54 = vpack.c.bf16 %v1436_v53, %v1436_v53 }
 0x270   : > { %v3269_v55 = vpop.f32.mrf.mxu0  ;;  %v1488_v58 = vpop.f32.mrf.mxu1 }
 0x271   : > { %3282 = vmatmul.mubr.msk.bf16.vlgmr.msra.gmra.mxu0 %vm1498_vm3, %v1494_v51  ;;  %v1623_v56 = vsel %vm1621_vm4, %v1616_v54, 0  ;;  %v1617_v59 = vpack.c.bf16 %v1488_v58, %v1488_v58 }
 0x272   : > { %3288 = vmatmul.mubr.msk.bf16.vlgmr.msra.gmra.mxu1 %vm1498_vm3, %v1495_v52  ;;  %3293 = vmatprep.mubr.msk.bf16.mxu0 %vm3645_vm1, %v3644_v17  ;;  %v1439_v57 = vpop.f32.mrf.mxu0  ;;  %v3277_v61 = vpop.f32.mrf.mxu1 }
 0x273   : > { %3299 = vmatprep.mubr.msk.bf16.mxu1 %vm3645_vm1, %v3644_v17  ;;  %3292 = vmatpush3.bf16.msra.mxu0 %v1623_v56  ;;  %v1669_v62 = vsel %vm1621_vm4, %v1617_v59, 0 }
 0x274   : > { %3303 = vmatprep.subr.bf16.mxu0 %v3644_v17  ;;  %v3270_v60 = vpop.f32.mrf.mxu0  ;;  %v1491_v63 = vpop.f32.mrf.mxu1  ;;  %3298 = vmatpush3.bf16.msra.mxu1 %v1669_v62 }
 0x275   : > { %3309 = vmatprep.subr.bf16.mxu1 %v3644_v17 }
 0x276   : > { %v3278_v0 = vpop.f32.mrf.mxu1 }
 0x277   : > { %v3508_v0 = vld [vmem:[%s3906_s28 + $0x8] sm:$0xff]  }
 0x331   : > { %v1539_v2 = vpop.f32.mrf.mxu0 }
 0x332   : > { %v1540_v3 = vadd.f32 %v1539_v2, %v1147_v1  ;;  %v1585_v4 = vpop.f32.mrf.mxu1  ;;  %v3510_v2 = vld [vmem:[%s3906_s28] sm:$0xff]  }
 0x333   : > { %v3283_v5 = vpop.f32.mrf.mxu0  ;;  %v1586_v6 = vadd.f32 %v1585_v4, %v1147_v1  ;;  %v3509_v1 = vld [vmem:[%s3906_s28 + $0x18] sm:$0xff]  }
 0x334   : > { %v3289_v7 = vpop.f32.mrf.mxu1  ;;  %v1592_v8 = vsel %vm1591_vm5, %v1540_v3, -inf }
 0x335   : > { %1593 = vmax.xlane.f32.xlu0 %v1592_v8  ;;  %v1542_v9 = vpop.f32.mrf.mxu0  ;;  %v1595_v13 = vsel %vm1591_vm5, %v1586_v6, -inf }
 0x336   : > { %v1588_v10 = vpop.f32.mrf.mxu1  ;;  %v3106_v9 = vld [vmem:[%s4376_s25] ss:$0 sm:$0xff] }
 0x337   : > { %v3284_v11 = vpop.f32.mrf.mxu0 }
 0x338   : > { %v3290_v12 = vpop.f32.mrf.mxu1 }
 0x339   : > { %1596 = vmax.xlane.f32.xlu0 %v1595_v13  ;;  %v3512_v12 = vld [vmem:[%s3911_s21 + $0x8] sm:$0xff]   ;;  %v3513_v13 = vld [vmem:[%s3911_s21 + $0x18] sm:$0xff]  }
 0x3be   : > { %v1594_v14 = vpop.xlane.xlu0 %1593 }
 0x3bf   : > { %v1598_v15 = vsub.f32 %v1540_v3, %v1594_v14  ;;  %v3511_v3 = vld [vmem:[%s3906_s28 + $0x10] sm:$0xff]   ;;  %s4373_s28 = sld [smem:[#allocation34_spill]] }
 0x3c1   : > { %v1600_v16 = vmul.f32 1.442695, %v1598_v15  ;;  %v3514_v15 = vld [vmem:[%s3911_s21] sm:$0xff]  }
 0x3c2   : > { %v1597_v18 = vpop.xlane.xlu0 %1596 }
 0x3c3   : > { %3528 = vpow2.f32 %v1600_v16  ;;  %v1599_v19 = vsub.f32 %v1586_v6, %v1597_v18  ;;  %v3515_v16 = vld [vmem:[%s3911_s21 + $0x10] sm:$0xff]   ;;  %v1845_v18 = vld [vmem:[%s4372_s0] sm:$0xff]  ;;  %s4378_s21 = sld [smem:[#allocation18_spill]] }
 0x3c5   : > { %v1602_v20 = vmul.f32 1.442695, %v1599_v19  ;;  %s4374_s22 = scalar_lea.vmem %s4373_s28, %s3852_s1  ;;  %v1846_v19 = vld [vmem:[%s4372_s0 + $0x8] sm:$0xf]  ;;  %s4386_s0 = scalar_lea.vmem %s4385_s23, %s3852_s1 }
 0x3c6   : > { %v3105_v7 = vld [vmem:[%s4374_s22] ss:$0 sm:$0xff]  ;;  %s3646_s1 = smov [#allocation2]  }
 0x3c7   : > { %3530 = vpow2.f32 %v1602_v20  ;;  %v1847_v20 = vpack.c.bf16 %v1846_v19, %v1845_v18 }
 0x3c9   : > { %s4380_s11 = scalar_lea.vmem %s4379_s13, %s4378_s21 }
 0x3d0   : > { %v3529_v22 = vpop.eup %3528 }
 0x3d1   : > { %v1604_v23 = vsel %vm1591_vm5, %v3529_v22, 0.0 }
 0x3d2   : > { %1605 = vadd.xlane.f32.xlu1 %v1604_v23  ;;  %v3517_v23 = vld [vmem:[%s4377_s19 + $0x18] sm:$0xff]  }
 0x3d4   : > { %v3531_v24 = vpop.eup %3530 }
 0x3d5   : > { %v1607_v25 = vsel %vm1591_vm5, %v3531_v24, 0.0 }
 0x3d6   : > { %1608 = vadd.xlane.f32.xlu1 %v1607_v25  ;;  %v3519_v25 = vld [vmem:[%s4377_s19 + $0x10] sm:$0xff]  }
 0x45b   : > { %v1606_v26 = vpop.xlane.xlu1 %1605 }
 0x45c   : > { %3532 = vrcp.f32 %v1606_v26 }
 0x45f   : > { %v1609_v27 = vpop.xlane.xlu1 %1608 }
 0x460   : > { %3534 = vrcp.f32 %v1609_v27 }
 0x469   : > { %v3533_v28 = vpop.eup %3532 }
 0x46a   : > { %v1612_v29 = vmul.f32 %v3533_v28, %v3529_v22  ;;  %v3516_v22 = vld [vmem:[%s4377_s19 + $0x8] sm:$0xff]  }
 0x46c   : > { %v1614_v30 = vpack.c.bf16 %v1612_v29, %v1612_v29 }
 0x46d   : > { %v3535_v31 = vpop.eup %3534 }
 0x46e   : > { %3294 = vmatmul.mubr.msk.bf16.vlgmr.msra.gmra.mxu0 %vm1591_vm5, %v1614_v30  ;;  %v1613_v32 = vmul.f32 %v3535_v31, %v3531_v24  ;;  %v3518_v24 = vld [vmem:[%s4377_s19] sm:$0xff]  }
 0x46f   : > { %3305 = vmatprep.mubr.msk.bf16.mxu0 %vm3645_vm1, %v3644_v17  ;;  %3304 = vmatpush3.bf16.msra.mxu0 %v3506_v34 }
 0x470   : > { %v1615_v33 = vpack.c.bf16 %v1613_v32, %v1613_v32  ;;  %3315 = vmatprep.subr.bf16.mxu0 %v3644_v17 }
 0x472   : > { %3300 = vmatmul.mubr.msk.bf16.vlgmr.msra.gmra.mxu1 %vm1591_vm5, %v1615_v33 }
 0x473   : > { %3311 = vmatprep.mubr.msk.bf16.mxu1 %vm3645_vm1, %v3644_v17  ;;  %3310 = vmatpush3.bf16.msra.mxu1 %v3507_v35 }
 0x474   : > { %3323 = vmatprep.subr.bf16.mxu1 %v3644_v17 }
 0x52e   : > { %v1659_v36 = vpop.f32.mrf.mxu0 }
 0x52f   : > { %v1711_v37 = vpack.c.bf16 %v1659_v36, %v1659_v36 }
 0x530   : > { %v3295_v38 = vpop.f32.mrf.mxu0 }
 0x531   : > { %3306 = vmatmul.mubr.msk.bf16.vlgmr.msra.gmra.mxu0 %vm1498_vm3, %v1711_v37 }
 0x532   : > { %v1662_v39 = vpop.f32.mrf.mxu0  ;;  %v1705_v40 = vpop.f32.mrf.mxu1  ;;  %3319 = vmatprep.mubr.msk.bf16.mxu0 %vm3645_vm1, %v3644_v17  ;;  %3316 = vmatpush3.bf16.msra.mxu0 %v3508_v0 }
 0x533   : > { %v1712_v41 = vpack.c.bf16 %v1705_v40, %v1705_v40  ;;  %3317 = vmatprep.subr.bf16.mxu0 %v3644_v17 }
 0x534   : > { %v3296_v42 = vpop.f32.mrf.mxu0  ;;  %v3301_v43 = vpop.f32.mrf.mxu1 }
 0x535   : > { %3312 = vmatmul.mubr.msk.bf16.vlgmr.msra.gmra.mxu1 %vm1498_vm3, %v1712_v41 }
 0x536   : > { %v1708_v44 = vpop.f32.mrf.mxu1  ;;  %3327 = vmatprep.mubr.msk.bf16.mxu1 %vm3645_vm1, %v3644_v17  ;;  %3324 = vmatpush3.bf16.msra.mxu1 %v3509_v1 }
 0x537   : > { %3325 = vmatprep.subr.bf16.mxu1 %v3644_v17  ;;  %3318 = vmatpush3.bf16.msra.mxu0 %v3510_v2 }
 0x538   : > { %v3302_v45 = vpop.f32.mrf.mxu1  ;;  %3331 = vmatprep.subr.bf16.mxu0 %v3644_v17 }
 0x53a   : > { %3326 = vmatpush3.bf16.msra.mxu1 %v3511_v3 }
 0x53b   : > { %3339 = vmatprep.subr.bf16.mxu1 %v3644_v17 }
 0x5f1   : > { %v1756_v46 = vpop.f32.mrf.mxu0 }
 0x5f2   : > { %v1811_v50 = vsel %vm1190_vm2, %v1756_v46, 0.0 }
 0x5f3   : > { %v3307_v47 = vpop.f32.mrf.mxu0 }
 0x5f5   : > { %v1759_v48 = vpop.f32.mrf.mxu0  ;;  %v1805_v49 = vpop.f32.mrf.mxu1 }
 0x5f6   : > { %v1812_v51 = vsel %vm1190_vm2, %v1805_v49, 0.0 }
 0x5f7   : > { %v1813_v52 = vadd.f32 %v1812_v51, %v1811_v50  ;;  %v3308_v53 = vpop.f32.mrf.mxu0  ;;  %v3313_v54 = vpop.f32.mrf.mxu1 }
 0x5f9   : > { %v1808_v55 = vpop.f32.mrf.mxu1  ;;  %v1814_v56 = vadd.f32 %v1813_v52, %v3984_v21 }
 0x5fb   : > { %v3314_v57 = vpop.f32.mrf.mxu1  ;;  %v1817_v58 = vsel %vm1190_vm2, %v1814_v56, 0.0 }
 0x5fc   : > { %1818 = vadd.xlane.f32.xlu0 %v1817_v58 }
 0x685   : > { %v1819_v59 = vpop.xlane.xlu0 %1818 }
 0x686   : > { %v1821_v60 = vmul.f32 0.03125, %v1819_v59 }
 0x688   : > { %v1822_v61 = vsub.f32 %v1814_v56, %v1821_v60  ;;  %v3125_v60 = vld [vmem:[%s4380_s11] ss:$0 sm:$0xff]  ;;  %s2751_s11 = sshll.u32 %s3958_s10, 4  ;;  %s2752_s11 = int_to_ptr.vmem [resolvable:$true] %s2751_s11 }
 0x68a   : > { %v1823_v62 = vmul.f32 %v1822_v61, %v1822_v61 }
 0x68c   : > { %v1824_v63 = vsel %vm1190_vm2, %v1823_v62, 0.0 }
 0x68d   : > { %1825 = vadd.xlane.f32.xlu1 %v1824_v63 }
 0x716   : > { %v1826_v21 = vpop.xlane.xlu1 %1825 }
 0x717   : > { %v1827_v4 = vmul.f32 0.03125, %v1826_v21 }
 0x719   : > { %v1828_v5 = vadd.f32 1e-06, %v1827_v4 }
 0x71b   : > { %3536 = vrsqrt.f32 %v1828_v5 }
 0x728   : > { %v3537_v6 = vpop.eup %3536 }
 0x729   : > { %v1830_v8 = vmul.f32 %v3537_v6, %v1822_v61 }
 0x72b   : > { %v1837_v10 = vmul.f32 %v3105_v7, %v1830_v8 }
 0x72d   : > { %v4080_v11 = vadd.f32 %v3106_v9, %v1837_v10 }
 0x72f   : > { %v1848_v14 = vpack.c.bf16 %v4080_v11, %v4080_v11 }
 0x731   : > { %3320 = vmatmul.mubr.msk.bf16.vlgmr.msra.gmra.mxu0 %vm1190_vm2, %v1848_v14  ;;  %3328 = vmatmul.mubr.msk.bf16.vlgmr.msra.gmra.mxu1 %vm1190_vm2, %v1848_v14 }
 0x732   : > { %3332 = vmatpush3.bf16.msra.mxu0 %v3512_v12  ;;  %3340 = vmatpush3.bf16.msra.mxu1 %v3513_v13 }
 0x733   : > { %3333 = vmatprep.subr.bf16.mxu0 %v3644_v17  ;;  %3341 = vmatprep.subr.bf16.mxu1 %v3644_v17 }
 0x734   : > { %3335 = vmatprep.mubr.msk.bf16.mxu0 %vm3645_vm1, %v3644_v17  ;;  %3343 = vmatprep.mubr.msk.bf16.mxu1 %vm3645_vm1, %v3644_v17 }
 0x736   : > { %3334 = vmatpush3.bf16.msra.mxu0 %v3514_v15  ;;  %3342 = vmatpush3.bf16.msra.mxu1 %v3515_v16 }
 0x737   : > { %3347 = vmatprep.subr.bf16.mxu0 %v3644_v17  ;;  %3355 = vmatprep.subr.bf16.mxu1 %v3644_v17 }
 0x739   : > { %3336 = vmatmul.mubr.msk.bf16.vlgmr.msra.gmra.mxu0 %vm1190_vm2, %v1847_v20  ;;  %3344 = vmatmul.mubr.msk.bf16.vlgmr.msra.gmra.mxu1 %vm1190_vm2, %v1847_v20 }
 0x73a   : > { %3351 = vmatprep.mubr.msk.bf16.mxu0 %vm3645_vm1, %v3644_v17  ;;  %3359 = vmatprep.mubr.msk.bf16.mxu1 %vm3645_vm1, %v3644_v17 }
 0x73b   : > { %3348 = vmatpush3.bf16.msra.mxu0 %v3516_v22  ;;  %3356 = vmatpush3.bf16.msra.mxu1 %v3517_v23 }
 0x73c   : > { %3349 = vmatprep.subr.bf16.mxu0 %v3644_v17  ;;  %3357 = vmatprep.subr.bf16.mxu1 %v3644_v17 }
 0x73f   : > { %3350 = vmatpush3.bf16.msra.mxu0 %v3518_v24  ;;  %3358 = vmatpush3.bf16.msra.mxu1 %v3519_v25 }
 0x740   : > { %3363 = vmatprep.subr.bf16.mxu0 %v3644_v17  ;;  %3369 = vmatprep.subr.bf16.mxu1 %v3644_v17 }
 0x742   : > { %3352 = vmatmul.mubr.msk.bf16.vlgmr.msra.gmra.mxu0 %vm1190_vm2, %v1847_v20  ;;  %3360 = vmatmul.mubr.msk.bf16.vlgmr.msra.gmra.mxu1 %vm1190_vm2, %v1847_v20 }
 0x743   : > { %3365 = vmatprep.mubr.msk.bf16.mxu0 %vm3645_vm1, %v3644_v17  ;;  %3371 = vmatprep.mubr.msk.bf16.mxu1 %vm3645_vm1, %v3644_v17 }
 0x7f1   : > { %v1926_v26 = vpop.f32.mrf.mxu0  ;;  %v1978_v27 = vpop.f32.mrf.mxu1 }
 0x7f2   : > { %v2199_v46 = vpack.c.bf16 %v1926_v26, %v1926_v26  ;;  %v2200_v47 = vpack.c.bf16 %v1978_v27, %v1978_v27  ;;  %v3521_v27 = vld [vmem:[%s4381_s29 + $0x8] sm:$0xff]  }
 0x7f3   : > { %v3321_v28 = vpop.f32.mrf.mxu0  ;;  %v3329_v29 = vpop.f32.mrf.mxu1 }
 0x7f4   : > { %v3520_v29 = vld [vmem:[%s4381_s29] sm:$0xff]  }
 0x7f5   : > { %v1929_v30 = vpop.f32.mrf.mxu0  ;;  %v1981_v31 = vpop.f32.mrf.mxu1 }
 0x7f7   : > { %v3322_v32 = vpop.f32.mrf.mxu0  ;;  %v3330_v33 = vpop.f32.mrf.mxu1 }
 0x7f9   : > { %v2033_v34 = vpop.f32.mrf.mxu0  ;;  %v2086_v35 = vpop.f32.mrf.mxu1 }
 0x7fb   : > { %v3337_v36 = vpop.f32.mrf.mxu0  ;;  %v3345_v37 = vpop.f32.mrf.mxu1 }
 0x7fd   : > { %v2036_v38 = vpop.f32.mrf.mxu0  ;;  %v2089_v39 = vpop.f32.mrf.mxu1 }
 0x7fe   : > { %v2201_v40 = vpack.c.bf16 %v2036_v38, %v2033_v34  ;;  %v2202_v41 = vpack.c.bf16 %v2089_v39, %v2086_v35 }
 0x7ff   : > { %v3338_v42 = vpop.f32.mrf.mxu0  ;;  %v3346_v43 = vpop.f32.mrf.mxu1 }
 0x800   : > { %v2213_v44 = vsel %vm1498_vm3, %v2201_v40, 0  ;;  %v2259_v45 = vsel %vm1498_vm3, %v2202_v41, 0 }
 0x801   : > { %3364 = vmatpush3.bf16.xpose.msra.mxu0 %v2213_v44  ;;  %3370 = vmatpush3.bf16.xpose.msra.mxu1 %v2259_v45 }
 0x802   : > { %3375 = vmatprep.subr.bf16.mxu0 %v3644_v17  ;;  %3381 = vmatprep.subr.bf16.mxu1 %v3644_v17  ;;  %v2139_v48 = vpop.f32.mrf.mxu0  ;;  %v2192_v49 = vpop.f32.mrf.mxu1 }
 0x804   : > { %v3353_v50 = vpop.f32.mrf.mxu0  ;;  %v3361_v51 = vpop.f32.mrf.mxu1 }
 0x806   : > { %v2142_v52 = vpop.f32.mrf.mxu0  ;;  %v2195_v53 = vpop.f32.mrf.mxu1 }
 0x807   : > { %v2326_v54 = vpack.c.bf16 %v2142_v52, %v2139_v48  ;;  %v2327_v55 = vpack.c.bf16 %v2195_v53, %v2192_v49 }
 0x808   : > { %3366 = vmatmul.mubr.msk.bf16.vlgmr.msra.gmra.mxu0 %vm1498_vm3, %v2199_v46  ;;  %3372 = vmatmul.mubr.msk.bf16.vlgmr.msra.gmra.mxu1 %vm1498_vm3, %v2200_v47  ;;  %v3354_v56 = vpop.f32.mrf.mxu0  ;;  %v3362_v57 = vpop.f32.mrf.mxu1 }
 0x809   : > { %3377 = vmatprep.mubr.msk.bf16.mxu0 %vm3645_vm1, %v3644_v17  ;;  %3383 = vmatprep.mubr.msk.bf16.mxu1 %vm3645_vm1, %v3644_v17  ;;  %v2333_v58 = vsel %vm2331_vm6, %v2326_v54, 0  ;;  %v2379_v59 = vsel %vm2331_vm6, %v2327_v55, 0 }
 0x80a   : > { %3376 = vmatpush3.bf16.msra.mxu0 %v2333_v58  ;;  %3382 = vmatpush3.bf16.msra.mxu1 %v2379_v59  ;;  %v3522_v59 = vld [vmem:[%s4382_s14 + $0x8] sm:$0xff]  }
 0x80b   : > { %3387 = vmatprep.subr.bf16.mxu0 %v3644_v17  ;;  %3393 = vmatprep.subr.bf16.mxu1 %v3644_v17 }
 0x8c8   : > { %v2249_v61 = vpop.f32.mrf.mxu0  ;;  %v2295_v62 = vpop.f32.mrf.mxu1 }
 0x8c9   : > { %v2250_v63 = vadd.f32 %v3125_v60, %v2249_v61  ;;  %v2296_v0 = vadd.f32 %v3125_v60, %v2295_v62  ;;  %v3523_v60 = vld [vmem:[%s4382_s14] sm:$0xff]   ;;  %v3525_v61 = vld [vmem:[%s3943_s24 + $0x10] sm:$0xff]  }
 0x8ca   : > { %v3367_v1 = vpop.f32.mrf.mxu0  ;;  %v3373_v2 = vpop.f32.mrf.mxu1 }
 0x8cb   : > { %v2305_v3 = vsel %vm2301_vm7, %v2296_v0, -inf  ;;  %v2302_v21 = vsel %vm2301_vm7, %v2250_v63, -inf  ;;  %v3134_v2 = vld [vmem:[%s4384_s2] ss:$0 sm:$0xff] }
 0x8cc   : > { %2306 = vmax.xlane.f32.xlu1 %v2305_v3  ;;  %v2298_v4 = vpop.f32.mrf.mxu1  ;;  %2303 = vmax.xlane.f32.xlu0 %v2302_v21  ;;  %v2252_v5 = vpop.f32.mrf.mxu0  ;;  %v3135_v21 = vld [vmem:[%s4386_s0] ss:$0 sm:$0xff] }
 0x8ce   : > { %v3368_v6 = vpop.f32.mrf.mxu0  ;;  %v3374_v7 = vpop.f32.mrf.mxu1 }
 0x8cf   : > { %v3526_v7 = vld [vmem:[%s3943_s24 + $0x8] sm:$0xff]  }
 0x955   : > { %v2307_v8 = vpop.xlane.xlu1 %2306  ;;  %v2304_v9 = vpop.xlane.xlu0 %2303 }
 0x956   : > { %v2309_v10 = vsub.f32 %v2296_v0, %v2307_v8  ;;  %v2308_v12 = vsub.f32 %v2250_v63, %v2304_v9  ;;  %v3527_v8 = vld [vmem:[%s3943_s24] sm:$0xff]  }
 0x957   : > { %v3136_v9 = vld [vmem:[%s1093_s27] ss:$0 sm:$0xff]  ;;  %s4389_s27 = sld [smem:[#allocation9_spill]] }
 0x958   : > { %v2312_v13 = vmul.f32 1.442695, %v2309_v10  ;;  %v2310_v14 = vmul.f32 1.442695, %v2308_v12 }
 0x95a   : > { %3538 = vpow2.f32 %v2312_v13 }
 0x95b   : > { %3540 = vpow2.f32 %v2310_v14 }
 0x95d   : > { %s3149_s13 = sshll.u32 %s4389_s27, 7 }
 0x95e   : > { %s2749_s18 = scalar_lea.hbm %s4394_s15, %s3149_s13 }
 0x967   : > { %v3539_v15 = vpop.eup %3538 }
 0x968   : > { %v3541_v16 = vpop.eup %3540  ;;  %v2317_v18 = vsel %vm2301_vm7, %v3539_v15, 0.0 }
 0x969   : > { %2318 = vadd.xlane.f32.xlu1 %v2317_v18  ;;  %v2314_v19 = vsel %vm2301_vm7, %v3541_v16, 0.0 }
 0x96a   : > { %2315 = vadd.xlane.f32.xlu0 %v2314_v19 }
 0x9f2   : > { %v2319_v20 = vpop.xlane.xlu1 %2318 }
 0x9f3   : > { %3542 = vrcp.f32 %v2319_v20  ;;  %v2316_v22 = vpop.xlane.xlu0 %2315 }
 0x9f4   : > { %3544 = vrcp.f32 %v2316_v22 }
 0xa00   : > { %v3543_v23 = vpop.eup %3542 }
 0xa01   : > { %v3545_v24 = vpop.eup %3544  ;;  %v2323_v25 = vmul.f32 %v3543_v23, %v3539_v15 }
 0xa02   : > { %v2322_v26 = vmul.f32 %v3545_v24, %v3541_v16 }
 0xa03   : > { %v2325_v28 = vpack.c.bf16 %v2323_v25, %v2323_v25 }
 0xa04   : > { %v2324_v30 = vpack.c.bf16 %v2322_v26, %v2322_v26 }
 0xa05   : > { %3384 = vmatmul.mubr.msk.bf16.vlgmr.msra.gmra.mxu1 %vm2301_vm7, %v2325_v28 }
 0xa06   : > { %3378 = vmatmul.mubr.msk.bf16.vlgmr.msra.gmra.mxu0 %vm2301_vm7, %v2324_v30  ;;  %3394 = vmatpush3.bf16.msra.mxu1 %v3521_v27 }
 0xa07   : > { %3388 = vmatpush3.bf16.msra.mxu0 %v3520_v29  ;;  %3389 = vmatprep.mubr.msk.bf16.mxu0 %vm3645_vm1, %v3644_v17 }
 0xa08   : > { %3395 = vmatprep.mubr.msk.bf16.mxu1 %vm3645_vm1, %v3644_v17  ;;  %3399 = vmatprep.subr.bf16.mxu0 %v3644_v17 }
 0xa09   : > { %3407 = vmatprep.subr.bf16.mxu1 %v3644_v17 }
 0xac5   : > { %v2415_v31 = vpop.f32.mrf.mxu1 }
 0xac6   : > { %v2369_v32 = vpop.f32.mrf.mxu0  ;;  %v2422_v33 = vpack.c.bf16 %v2415_v31, %v2415_v31 }
 0xac7   : > { %v2421_v34 = vpack.c.bf16 %v2369_v32, %v2369_v32  ;;  %v3385_v35 = vpop.f32.mrf.mxu1 }
 0xac8   : > { %v3379_v36 = vpop.f32.mrf.mxu0  ;;  %3396 = vmatmul.mubr.msk.bf16.vlgmr.msra.gmra.mxu1 %vm1498_vm3, %v2422_v33 }
 0xac9   : > { %3390 = vmatmul.mubr.msk.bf16.vlgmr.msra.gmra.mxu0 %vm1498_vm3, %v2421_v34  ;;  %v2418_v37 = vpop.f32.mrf.mxu1  ;;  %3415 = vmatprep.mubr.msk.bf16.mxu1 %vm3645_vm1, %v3644_v17  ;;  %v3146_v36 = vld [vmem:[%s1104_s6] ss:$0 sm:$0xff]  ;;  %s3550_s6 = scalar_lea.vmem %s2752_s11, 128 }
 0xaca   : > { %v2372_v38 = vpop.f32.mrf.mxu0  ;;  %3403 = vmatprep.mubr.msk.bf16.mxu0 %vm3645_vm1, %v3644_v17  ;;  %3400 = vmatpush3.bf16.msra.mxu0 %v3522_v59  ;;  %p3551_p1 = scmp.ne.s32.totalorder %s2752_s11, %s3550_s6 }
 0xacb   : > { %v3386_v39 = vpop.f32.mrf.mxu1  ;;  %3401 = vmatprep.subr.bf16.mxu0 %v3644_v17  ;;  %v3147_v38 = vld [vmem:[%s1107_s7] ss:$0 sm:$0xff]  ;;  %s3554_s7 = sshll.u32 %s3646_s1, 4  ;;  %s3555_s7 = int_to_ptr.vmem [resolvable:$false] %s3554_s7 }
 0xacc   : > { %v3380_v40 = vpop.f32.mrf.mxu0  ;;  %p3552_p2 = pnand %p3551_p1, %p3821_p3  ;;  %s3556_s8 = scalar_lea.vmem %s3555_s7, 256 }
 0xacd   : > { %p3557_p5 = scmp.lt.s32.totalorder %s2752_s11, %s3555_s7  ;;  %p3558_p6 = scmp.lt.s32.totalorder %s3556_s8, %s3550_s6 }
 0xace   : > { %3402 = vmatpush3.bf16.msra.mxu0 %v3523_v60  ;;  %p3553_p4 = pneg %p3552_p2 }
 0xacf   : > { %p3559_p7 = por %p3558_p6, %p3557_p5 }
 0xad1   : > { %p3560_p8 = pnand %p3559_p7, %p3553_p4 }
 0xb88   : > { %v2515_v41 = vpop.f32.mrf.mxu1 }
 0xb89   : > { %v2466_v42 = vpop.f32.mrf.mxu0  ;;  %v2522_v43 = vsel %vm1190_vm2, %v2515_v41, 0.0 }
 0xb8a   : > { %v2521_v44 = vsel %vm1190_vm2, %v2466_v42, 0.0  ;;  %v3397_v45 = vpop.f32.mrf.mxu1 }
 0xb8b   : > { %v2523_v46 = vadd.f32 %v2522_v43, %v2521_v44  ;;  %v3391_v47 = vpop.f32.mrf.mxu0 }
 0xb8c   : > { %v2518_v48 = vpop.f32.mrf.mxu1 }
 0xb8d   : > { %v2469_v49 = vpop.f32.mrf.mxu0  ;;  %v2524_v50 = vadd.f32 %v2523_v46, %v4080_v11  ;;  %v3524_v11 = vld [vmem:[%s3943_s24 + $0x18] sm:$0xff]  }
 0xb8e   : > { %v3398_v51 = vpop.f32.mrf.mxu1  ;;  %3408 = vmatpush3.bf16.msra.mxu1 %v3524_v11 }
 0xb8f   : > { %v3392_v52 = vpop.f32.mrf.mxu0  ;;  %v2527_v53 = vsel %vm1190_vm2, %v2524_v50, 0.0  ;;  %3409 = vmatprep.subr.bf16.mxu1 %v3644_v17 }
 0xb90   : > { %2528 = vadd.xlane.f32.xlu0 %v2527_v53 }
 0xb92   : > { %3410 = vmatpush3.bf16.msra.mxu1 %v3525_v61 }
 0xb93   : > { %3411 = vmatprep.subr.bf16.mxu1 %v3644_v17 }
 0xb96   : > { %3412 = vmatpush3.bf16.msra.mxu1 %v3526_v7 }
 0xb97   : > { %3413 = vmatprep.subr.bf16.mxu1 %v3644_v17  ;;  %v3140_v17 = vld [vmem:[%s1101_s16] ss:$0 sm:$0xff]  ;;  %s4390_s16 = sld [smem:[#allocation6_spill]] }
 0xb9a   : > { %3414 = vmatpush3.bf16.msra.mxu1 %v3527_v8 }
 0xb9d   : > { %s4395_s5 = sand.u32 1, %s4390_s16  }
 0xb9e   : > { %s2738_s2 = scalar_lea.sflag [#allocation3], %s4395_s5 }
 0xc19   : > { %v2529_v54 = vpop.xlane.xlu0 %2528 }
 0xc1a   : > { %v2530_v55 = vmul.f32 0.03125, %v2529_v54 }
 0xc1c   : > { %v2531_v56 = vsub.f32 %v2524_v50, %v2530_v55 }
 0xc1e   : > { %v2532_v57 = vmul.f32 %v2531_v56, %v2531_v56 }
 0xc20   : > { %v2533_v58 = vsel %vm1190_vm2, %v2532_v57, 0.0 }
 0xc21   : > { %2534 = vadd.xlane.f32.xlu1 %v2533_v58 }
 0xcaa   : > { %v2535_v62 = vpop.xlane.xlu1 %2534 }
 0xcab   : > { %v2536_v63 = vmul.f32 0.03125, %v2535_v62 }
 0xcad   : > { %v2537_v0 = vadd.f32 1e-06, %v2536_v63 }
 0xcaf   : > { %3546 = vrsqrt.f32 %v2537_v0 }
 0xcbc   : > { %v3547_v1 = vpop.eup %3546 }
 0xcbd   : > { %v2539_v3 = vmul.f32 %v3547_v1, %v2531_v56 }
 0xcbf   : > { %v2546_v4 = vmul.f32 %v3134_v2, %v2539_v3 }
 0xcc1   : > { %v2553_v5 = vadd.f32 %v3135_v21, %v2546_v4 }
 0xcc3   : > { %v2554_v6 = vpack.c.bf16 %v2553_v5, %v2553_v5 }
 0xcc5   : > { %3404 = vmatmul.mubr.msk.bf16.vlgmr.msra.gmra.mxu0 %vm1190_vm2, %v2554_v6 }
 0xd85   : > { %v2615_v10 = vpop.f32.mrf.mxu0 }
 0xd86   : > { %v2616_v12 = vadd.f32 %v3136_v9, %v2615_v10 }
 0xd87   : > { %v3405_v13 = vpop.f32.mrf.mxu0 }
 0xd88   : > { %v2621_v14 = vmax.f32 %v2616_v12, 0.0 }
 0xd89   : > { %v2618_v15 = vpop.f32.mrf.mxu0 }
 0xd8a   : > { %v2622_v16 = vpack.c.bf16 %v2621_v14, %v2621_v14 }
 0xd8b   : > { %v3406_v18 = vpop.f32.mrf.mxu0 }
 0xd8c   : > { %3416 = vmatmul.mubr.msk.bf16.vlgmr.msra.gmra.mxu1 %vm2662_vm8, %v2622_v16 }
 0xe4c   : > { %v2700_v19 = vpop.f32.mrf.mxu1 }
 0xe4d   : > { %v2701_v20 = vadd.f32 %v3140_v17, %v2700_v19 }
 0xe4e   : > { %v3417_v22 = vpop.f32.mrf.mxu1 }
 0xe4f   : > { %v2706_v23 = vadd.f32 %v2701_v20, %v2553_v5 }
 0xe50   : > { %v2703_v24 = vpop.f32.mrf.mxu1 }
 0xe51   : > { %v2709_v25 = vsel %vm1190_vm2, %v2706_v23, 0.0 }
 0xe52   : > { %2710 = vadd.xlane.f32.xlu0 %v2709_v25  ;;  %v3418_v26 = vpop.f32.mrf.mxu1 }
 0xedb   : > { %v2711_v27 = vpop.xlane.xlu0 %2710 }
 0xedc   : > { %v2712_v28 = vmul.f32 0.03125, %v2711_v27 }
 0xede   : > { %v2713_v29 = vsub.f32 %v2706_v23, %v2712_v28 }
 0xee0   : > { %v2714_v30 = vmul.f32 %v2713_v29, %v2713_v29 }
 0xee2   : > { %v2715_v31 = vsel %vm1190_vm2, %v2714_v30, 0.0 }
 0xee3   : > { %2716 = vadd.xlane.f32.xlu1 %v2715_v31 }
 0xf6c   : > { %v2717_v32 = vpop.xlane.xlu1 %2716 }
 0xf6d   : > { %v2718_v33 = vmul.f32 0.03125, %v2717_v32 }
 0xf6f   : > { %v2719_v34 = vadd.f32 1e-06, %v2718_v33 }
 0xf71   : > { %3548 = vrsqrt.f32 %v2719_v34 }
 0xf7e   : > { %v3549_v35 = vpop.eup %3548 }
 0xf7f   : > { %v2721_v37 = vmul.f32 %v3549_v35, %v2713_v29 }
 0xf81   : > { %v2728_v39 = vmul.f32 %v3146_v36, %v2721_v37 }
 0xf83   : > { %v2735_v40 = vadd.f32 %v3147_v38, %v2728_v39 }
 0xf85   : > { %2736 = vst.msk [vmem:[%s3958_s10] sm:$0xff] %vm1190_vm2, %v2735_v40 }
 0xf86   : > { %3563 = shalt.err (!%p3560_p8)
}
 0xf87   : > { %s3564_s9 = scalar_lea.hbm %s2749_s18, 128  ;;  %s3568_s0 = scalar_lea.hbm %s4394_s15, 256 }
 0xf88   : > { %p3565_p10 = scmp.ne.s32.totalorder %s2749_s18, %s3564_s9  ;;  %p3569_p13 = scmp.lt.s32.totalorder %s2749_s18, %s4394_s15 }
 0xf89   : > { %p3570_p0 = scmp.lt.s32.totalorder %s3568_s0, %s3564_s9 }
 0xf8a   : > { %p3566_p11 = pnand %p3565_p10, %p3821_p3 }
 0xf8b   : > { %p3571_p1 = por %p3570_p0, %p3569_p13 }
 0xf8c   : > { %p3567_p12 = pneg %p3566_p11 }
 0xf8e   : > { %p3572_p2 = pnand %p3571_p1, %p3567_p12 }
 0xf90   : > { %3575 = shalt.err (!%p3572_p2)
}
 0xf91   : > { %3419 = dma.vmem_to_hbm [thread:$0]  (%p3821_p3), %s2752_s11, 128, %s2749_s18, %s2738_s2  }
 0xf92 PF: > { %s4396_s28 = sld [smem:[#allocation12_spill]] }
 0xf93   : > { %s4397_s22 = sld [smem:[#allocation5_spill]] }
 0xf98   : > { %p3425_p4 = scmp.ge.s32.totalorder %s4396_s28, 2 }
 0xf99   : > { %s2763_s3 = sand.u32 1, %s4397_s22  }
 0xf9a   : > { %p3422_p5 = pnand %p3425_p4, %p3831_p9  ;;  %s2764_s27 = scalar_lea.sflag [#allocation3], %s2763_s3 }
 0xf9c   : > { %p3423_p6 = pneg %p3422_p5 }
 0xf9e   : > { %3609 = dma.done.wait (%p3423_p6), %s2764_s27, 128  }
 0xf9f   : > { %3611 = vsyncadd (%p3423_p6), %s2764_s27, 4294967168  ;;  %s37_s0 = sadd.s32 1, %s4396_s28   ;;  %s4399_s5 = sld [smem:[#allocation6_spill]] }
 0xfa0   : > { %p34_p7 = scmp.ge.s32.totalorder %s37_s0, 6   ;;  %s4400_s26 = sld [smem:[#allocation7_spill]] }
 0xfa1   : > { %s4401_s27 = sld [smem:[#allocation17_spill]] }
 0xfa2   : > { %s4402_s28 = sld [smem:[#allocation10_spill]]  ;;  %36 = sbr.rel (!%p34_p7) target bundleno = 31 (0x1f), region = 218 }
 0xfa3   : > { %s4403_s6 = sld [smem:[#allocation11_spill]] }
 0xfa4   : > { %s4404_s2 = sld [smem:[#allocation13_spill]] }
 0xfa5   : > { %s4405_s29 = sld [smem:[#allocation15_spill]] }
 0xfa7   :  { %2769 = vsyncpa [#allocation3], 1 }
 0xfa8   :  { %2771 = vsyncpa [#allocation3 + $0x1], 1 }

</bundles_post_ra>
